<compile_context>
chip_gen: v7x
topology: tpu7x:2x2x1
jax: 0.10.0
libtpu: 0.0.40
codegen_flags: <defaults>
</compile_context>

<pallas_src>
import functools
from typing import NamedTuple

import jax
import jax.numpy as jnp
from jax.experimental import pallas as pl
from jax.experimental.pallas import tpu as pltpu


def _physical_vmem_bytes():
    try:
        return int(pltpu.get_tpu_info().vmem_capacity_bytes)
    except Exception:
        return 64 * 2**20  # conservative (v7x per-TC)


class PackedMoEWeights(NamedTuple):
    w13: jax.Array            # [E*nI, H, 2*i_tile]  (gate | up), pre-transposed
    w2: jax.Array             # [E*nI, i_tile, H]    down proj,  pre-transposed
    num_experts: int
    hidden_size: int
    intermediate_size: int
    i_tile: int
    n_i: int


def prepare_flashinfer_moe_weights(w13_weight, w2_weight, *, i_tile=None):
    """One-time weight relayout. Call at weight-load time, NOT per forward:
    under jit with weights as inputs these transposes would otherwise re-read
    every expert weight from HBM on every call."""
    E, two_i, H = w13_weight.shape
    inter = two_i // 2
    assert w2_weight.shape == (E, H, inter)

    if i_tile is None:
        # prefer the largest i_tile whose (double-buffered) weight blocks leave
        # at least half of the VMEM budget for activations.
        w_bytes = jnp.dtype(w13_weight.dtype).itemsize
        budget = (_physical_vmem_bytes() * 3) // 8
        i_tile = None
        for cand in (512, 256, 128):
            if inter % cand == 0 and 6 * H * cand * w_bytes <= budget:
                i_tile = cand
                break
        if i_tile is None:
            i_tile = 128 if inter % 128 == 0 else inter
    assert inter % i_tile == 0
    assert i_tile == inter or i_tile % 128 == 0
    n_i = inter // i_tile

    w1 = w13_weight[:, :inter, :]                                 # [E, I, H]
    w3 = w13_weight[:, inter:, :]                                 # [E, I, H]
    w1t = w1.transpose(0, 2, 1).reshape(E, H, n_i, i_tile)        # [E, H, nI, it]
    w3t = w3.transpose(0, 2, 1).reshape(E, H, n_i, i_tile)
    w13r = (jnp.concatenate([w1t, w3t], axis=-1)                  # [E, H, nI, 2it]
              .transpose(0, 2, 1, 3)
              .reshape(E * n_i, H, 2 * i_tile))                   # [E*nI, H, 2it]
    w2r = (w2_weight.transpose(0, 2, 1)                           # [E, I, H]
             .reshape(E, n_i, i_tile, H)
             .reshape(E * n_i, i_tile, H))                        # [E*nI, it, H]
    return PackedMoEWeights(w13r, w2r, E, H, inter, i_tile, n_i)


def _moe_kernel(blk_ref, hit_ref, cwe_ref,                 # scalar prefetch (SMEM)
                x_ref, w13_ref, w2_ref, cw_ref,            # inputs (VMEM blocks)
                o_ref,                                     # output block
                acc_ref,                                   # scratch
                *, num_experts, n_i_tiles, i_tile):
    """Grid = (token_tiles, experts, i_tiles); (expert, i_tile) are reductions."""
    t = pl.program_id(0)
    e = pl.program_id(1)
    ii = pl.program_id(2)

    @pl.when(jnp.logical_and(e == 0, ii == 0))
    def _():
        acc_ref[...] = jnp.zeros_like(acc_ref)

    # Does any token of this token tile route to expert e? (scalar SMEM read)
    hit = hit_ref[t * num_experts + e]

    @pl.when(hit > 0)
    def _():
        x = x_ref[...]                                     # (TT, H)       bf16
        # single fused gate|up projection (wide N fills the 256-lane MXU)
        gu = jnp.dot(x, w13_ref[...],
                     preferred_element_type=jnp.float32)   # (TT, 2*it)
        gate = gu[:, :i_tile]
        up = gu[:, i_tile:]
        cw = cw_ref[...]                                   # (TT, 1)       f32
        # silu(gate) * up, routing weight folded in BEFORE the down projection
        act = (gate * jax.nn.sigmoid(gate)) * up * cw
        # partial down projection, accumulated over (expert, i_tile)
        acc_ref[...] += jnp.dot(act.astype(w2_ref.dtype), w2_ref[...],
                                preferred_element_type=jnp.float32)  # (TT, H)

    @pl.when(jnp.logical_and(e == num_experts - 1, ii == n_i_tiles - 1))
    def _():
        o_ref[...] = acc_ref[...].astype(o_ref.dtype)


def flashinfer_fused_moe_forward(
    hidden_states,            # [T, H]  bf16
    router_logits,            # [T, E]  f32 / bf16
    packed: PackedMoEWeights, # from prepare_flashinfer_moe_weights
    *,
    top_k,
    renormalize=True,
    routed_scaling_factor=None,
    token_tile=256,
):
    assert renormalize, "Renormalize is required for flashinfer blockscale fp8 moe"
    T, H = hidden_states.shape
    assert H == packed.hidden_size
    E = packed.num_experts
    i_tile = packed.i_tile
    n_i = packed.n_i

    w_bytes = jnp.dtype(packed.w13.dtype).itemsize
    x_bytes = jnp.dtype(hidden_states.dtype).itemsize

    # ---- VMEM-aware tile sizing (v7x has only 64 MiB physical VMEM / TC) ----
    vmem_cap = (_physical_vmem_bytes() * 3) // 4      # 25% headroom

    def vmem_est(tt):
        return (2 * (H * 2 * i_tile + i_tile * H) * w_bytes   # dbl-buffered w13/w2 blocks
                + 2 * 2 * tt * H * x_bytes                    # x + out blocks
                + tt * H * 4                                  # f32 accumulator scratch
                + 2 * 2 * tt * 4                              # cw blocks
                + 3 * tt * 2 * i_tile * 4)                    # f32 gate/up/act temporaries

    token_tile = max(8, token_tile - token_tile % 8)
    while token_tile > 128 and vmem_est(token_tile) > vmem_cap:
        token_tile //= 2
    assert token_tile % 8 == 0

    # ---- routing (glue, plain JAX) ----
    probs = jax.nn.softmax(router_logits.astype(jnp.float32), axis=-1)
    topk_vals, topk_ids = jax.lax.top_k(probs, top_k)                  # [T, K]
    topk_vals = topk_vals / jnp.sum(topk_vals, axis=-1, keepdims=True)
    if routed_scaling_factor is not None:
        topk_vals = topk_vals * routed_scaling_factor
    dense_w = jnp.zeros((T, E), jnp.float32)
    dense_w = dense_w.at[jnp.arange(T)[:, None], topk_ids].add(topk_vals)

    # ---- token padding so T is a multiple of token_tile ----
    t_pad = (-T) % token_tile
    x = hidden_states
    if t_pad:
        x = jnp.pad(x, ((0, t_pad), (0, 0)))
        dense_w = jnp.pad(dense_w, ((0, t_pad), (0, 0)))
    Tp = T + t_pad
    n_t = Tp // token_tile

    combine_w = dense_w.T.reshape(E, Tp, 1)                            # [E, Tp, 1]

    # ---- expert-skip tables (scalar prefetch) ----
    # hit[t,e]: does token tile t route anything to expert e. (A selected
    # expert whose renormalized weight underflows to exactly 0 is skipped —
    # its contribution is zero anyway.)
    # blk[(t,e),ii]: weight block to have resident at step (t,e,ii); non-hit
    # steps repeat the block that is ACTUALLY resident, carried across token
    # tiles, so Pallas elides the DMA entirely (no spurious tile-start fetch).
    hit2 = (dense_w.reshape(n_t, token_tile, E) != 0).any(axis=1)      # [n_t, E]
    hit_b = hit2.reshape(-1)                                           # [n_t*E]
    e_flat = jnp.tile(jnp.arange(E, dtype=jnp.int32), n_t)             # [n_t*E]
    carry = jax.lax.cummax(jnp.where(hit_b, e_flat, -1), axis=0)       # last hit expert so far
    first_e = jnp.where(hit_b.any(), e_flat[jnp.argmax(hit_b)], 0).astype(jnp.int32)
    fetch_e = jnp.where(carry >= 0, carry, first_e).astype(jnp.int32)  # [n_t*E]

    ii_idx = jnp.arange(n_i, dtype=jnp.int32)
    blk = jnp.where(hit_b[:, None],
                    e_flat[:, None] * n_i + ii_idx[None, :],
                    fetch_e[:, None] * n_i + (n_i - 1))
    blk_flat = blk.reshape(-1).astype(jnp.int32)                       # [n_t*E*n_i]
    hit_flat = hit_b.astype(jnp.int32)                                 # [n_t*E]
    cwe_flat = jnp.where(hit_b, e_flat, fetch_e).astype(jnp.int32)     # [n_t*E]

    # 1-D SMEM arrays pad to next_pow2(4N); guard against SMEM blowup for very
    # long prefill with many experts.
    assert n_t * E * n_i <= (1 << 17), (
        "scalar-prefetch table too large for SMEM; chunk the token dimension "
        "outside the kernel")  # TODO(synk): chunk T / compact the table if hit

    # ---- index maps (grid indices + scalar-prefetch refs, positional) ----
    def xidx(t, e, ii, blk_r, hit_r, cwe_r):
        return (t, 0)

    def widx(t, e, ii, blk_r, hit_r, cwe_r):
        return (blk_r[(t * E + e) * n_i + ii], 0, 0)

    def cwidx(t, e, ii, blk_r, hit_r, cwe_r):
        return (cwe_r[t * E + e], t, 0)

    kernel = functools.partial(_moe_kernel, num_experts=E, n_i_tiles=n_i,
                               i_tile=i_tile)

    vmem_limit = int(min(vmem_cap, max(2 * vmem_est(token_tile), 32 * 2**20)))

    out = pl.pallas_call(
        kernel,
        out_shape=jax.ShapeDtypeStruct((Tp, H), hidden_states.dtype),
        grid_spec=pltpu.PrefetchScalarGridSpec(
            num_scalar_prefetch=3,
            grid=(n_t, E, n_i),
            in_specs=[
                pl.BlockSpec((token_tile, H), xidx),
                pl.BlockSpec((pl.Squeezed(), H, 2 * i_tile), widx),
                pl.BlockSpec((pl.Squeezed(), i_tile, H), widx),
                pl.BlockSpec((pl.Squeezed(), token_tile, 1), cwidx),
            ],
            out_specs=pl.BlockSpec((token_tile, H), xidx),
            scratch_shapes=[pltpu.VMEM((token_tile, H), jnp.float32)],
        ),
        compiler_params=pltpu.CompilerParams(
            dimension_semantics=("parallel", "arbitrary", "arbitrary"),
            vmem_limit_bytes=vmem_limit),
    )(blk_flat, hit_flat, cwe_flat, x, packed.w13, packed.w2, combine_w)

    return out[:T] if t_pad else out


def _reference_moe(x, router_logits, w13, w2, top_k, routed_scaling_factor=None):
    """Pure-JAX reference (mirrors the kernel's bf16 intermediate cast)."""
    T, H = x.shape
    E, two_i, _ = w13.shape
    inter = two_i // 2
    xf = x.astype(jnp.float32)
    probs = jax.nn.softmax(router_logits.astype(jnp.float32), axis=-1)
    vals, ids = jax.lax.top_k(probs, top_k)
    vals = vals / jnp.sum(vals, axis=-1, keepdims=True)
    if routed_scaling_factor is not None:
        vals = vals * routed_scaling_factor
    dense_w = jnp.zeros((T, E), jnp.float32)
    dense_w = dense_w.at[jnp.arange(T)[:, None], ids].add(vals)
    out = jnp.zeros((T, H), jnp.float32)
    for e in range(E):
        w1 = w13[e, :inter].astype(jnp.float32)          # [I, H]
        w3 = w13[e, inter:].astype(jnp.float32)          # [I, H]
        w2e = w2[e].astype(jnp.float32)                  # [H, I]
        gate = xf @ w1.T
        up = xf @ w3.T
        act = (gate * jax.nn.sigmoid(gate)) * up
        act = act.astype(jnp.bfloat16).astype(jnp.float32)
        y = act @ w2e.T
        out = out + dense_w[:, e:e + 1] * y
    return out


if __name__ == "__main__":
    # Small but TPU-tile-friendly shapes: T=384 pads to 512 with token_tile=256
    # (2 token tiles, exercises the padding + cross-tile DMA-carry path),
    # i_tile=128 forces n_i=2 (exercises the i-tiling reduction), and skewed
    # routing leaves most experts never hit (exercises the expert-skip path).
    num_tokens = 384
    hidden_size = 256
    intermediate_size = 256     # per-partition intermediate size (tp=1)
    num_experts = 32
    top_k = 2

    key = jax.random.PRNGKey(0)
    k_x, k_logits, k_w13, k_w2 = jax.random.split(key, 4)

    hidden_states = jax.random.normal(
        k_x, (num_tokens, hidden_size), dtype=jnp.float32).astype(jnp.bfloat16)
    router_logits = jax.random.normal(
        k_logits, (num_tokens, num_experts), dtype=jnp.float32)
    # Skew routing toward experts 5..12 so experts 0..4 and 13..31 are skipped.
    bias = jnp.zeros((num_experts,), jnp.float32).at[5:13].set(6.0)
    router_logits = router_logits + bias[None, :]

    # Shapes match UnquantizedFusedMoEMethod.create_weights: w13 [E, 2I, H], w2 [E, H, I].
    w13_weight = (jax.random.normal(
        k_w13, (num_experts, 2 * intermediate_size, hidden_size), dtype=jnp.float32)
        * (1.0 / jnp.sqrt(hidden_size))).astype(jnp.bfloat16)
    w2_weight = (jax.random.normal(
        k_w2, (num_experts, hidden_size, intermediate_size), dtype=jnp.float32)
        * (1.0 / jnp.sqrt(intermediate_size))).astype(jnp.bfloat16)

    # One-time weight relayout (cache this at weight-load time in real use).
    packed = prepare_flashinfer_moe_weights(w13_weight, w2_weight, i_tile=128)

    out = flashinfer_fused_moe_forward(
        hidden_states, router_logits, packed,
        top_k=top_k, renormalize=True, routed_scaling_factor=None,
        token_tile=256)
    out = jax.block_until_ready(out)

    ref = _reference_moe(hidden_states, router_logits, w13_weight, w2_weight, top_k)
    ref = jax.block_until_ready(ref)

    assert out.shape == (num_tokens, hidden_size)
    assert out.dtype == hidden_states.dtype
    err = float(jnp.max(jnp.abs(out.astype(jnp.float32) - ref)))
    scale = float(jnp.max(jnp.abs(ref))) + 1e-6
    assert err <= 3e-2 * scale + 1e-3, f"max abs error too large: {err} (ref scale {scale})"

    print("KERNEL_OK")
</pallas_src>

<mosaic_0001>
module attributes {stable_mosaic.version = 11 : i64} {
  func.func @_moe_kernel(%arg0: i32, %arg1: i32, %arg2: i32, %arg3: memref<128xi32, #tpu.memory_space<smem>>, %arg4: memref<64xi32, #tpu.memory_space<smem>>, %arg5: memref<64xi32, #tpu.memory_space<smem>>, %arg6: memref<256x256xbf16, #tpu.memory_space<vmem>>, %arg7: memref<1x256x256xbf16, #tpu.memory_space<vmem>>, %arg8: memref<1x128x256xbf16, #tpu.memory_space<vmem>>, %arg9: memref<1x256x1xf32, #tpu.memory_space<vmem>>, %arg10: memref<256x256xbf16, #tpu.memory_space<vmem>>, %arg11: memref<256x256xf32, #tpu.memory_space<vmem>>) attributes {dimension_semantics = [#tpu.dimension_semantics<parallel>, #tpu.dimension_semantics<arbitrary>, #tpu.dimension_semantics<arbitrary>], iteration_bounds = array<i64: 2, 32, 2>, scalar_prefetch = 3 : i64, scratch_operands = 1 : i64, tpu.core_type = #tpu.core_type<tc>, window_params = [{transform_indices = @transform_0, window_bounds = array<i64: 256, 256>}, {transform_indices = @transform_1, window_bounds = array<i64: 1, 256, 256>}, {transform_indices = @transform_2, window_bounds = array<i64: 1, 128, 256>}, {transform_indices = @transform_3, window_bounds = array<i64: 1, 256, 1>}, {transform_indices = @transform_4, window_bounds = array<i64: 256, 256>}]} {
    %c0_i32 = arith.constant 0 : i32
    %0 = arith.cmpi eq, %arg1, %c0_i32 : i32
    %c0_i32_0 = arith.constant 0 : i32
    %1 = arith.cmpi eq, %arg2, %c0_i32_0 : i32
    %2 = arith.andi %0, %1 : i1
    %3 = arith.extui %2 : i1 to i32
    %c0_i32_1 = arith.constant 0 : i32
    %4 = arith.cmpi ne, %3, %c0_i32_1 : i32
    scf.if %4 {
      %cst = arith.constant 0.000000e+00 : f32
      %17 = vector.broadcast %cst : f32 to vector<256x256xf32>
      %c0 = arith.constant 0 : index
      %c0_5 = arith.constant 0 : index
      %18 = vector.load %arg11[%c0, %c0_5] : memref<256x256xf32, #tpu.memory_space<vmem>>, vector<256x256xf32>
      tpu.vector_store %arg11[%c0, %c0_5], %17 {strides = array<i32>} : memref<256x256xf32, #tpu.memory_space<vmem>>, vector<256x256xf32>,
    } else {
    }
    %c32_i32 = arith.constant 32 : i32
    %5 = arith.muli %arg0, %c32_i32 : i32
    %6 = arith.addi %5, %arg1 : i32
    %7 = arith.index_cast %6 : i32 to index
    %8 = memref.load %arg4[%7] : memref<64xi32, #tpu.memory_space<smem>>
    %c0_i32_2 = arith.constant 0 : i32
    %9 = arith.cmpi sgt, %8, %c0_i32_2 : i32
    %10 = arith.extui %9 : i1 to i32
    %c0_i32_3 = arith.constant 0 : i32
    %11 = arith.cmpi ne, %10, %c0_i32_3 : i32
    scf.if %11 {
      %c0 = arith.constant 0 : index
      %c0_5 = arith.constant 0 : index
      %17 = vector.load %arg6[%c0, %c0_5] : memref<256x256xbf16, #tpu.memory_space<vmem>>, vector<256x256xbf16>
      %c0_6 = arith.constant 0 : index
      %c0_7 = arith.constant 0 : index
      %c0_8 = arith.constant 0 : index
      %18 = vector.load %arg7[%c0_6, %c0_7, %c0_8] : memref<1x256x256xbf16, #tpu.memory_space<vmem>>, vector<1x256x256xbf16>
      %19 = vector.shape_cast %18 : vector<1x256x256xbf16> to vector<256x256xbf16>
      %cst = arith.constant dense<0.000000e+00> : vector<256x256xf32>
      %20 = tpu.matmul %17, %19, %cst {dimension_numbers = #tpu.dot_dimension_numbers<[1], [0], [0], [1], [0, 0, 1, 1], [], []>} : vector<256x256xbf16>, vector<256x256xbf16>, vector<256x256xf32> -> vector<256x256xf32>
      %21 = vector.extract_strided_slice %20 {offsets = [0, 0], sizes = [256, 128], strides = [1, 1]} : vector<256x256xf32> to vector<256x128xf32>
      %22 = vector.extract_strided_slice %20 {offsets = [0, 128], sizes = [256, 128], strides = [1, 1]} : vector<256x256xf32> to vector<256x128xf32>
      %c0_9 = arith.constant 0 : index
      %c0_10 = arith.constant 0 : index
      %c0_11 = arith.constant 0 : index
      %23 = vector.load %arg9[%c0_9, %c0_10, %c0_11] : memref<1x256x1xf32, #tpu.memory_space<vmem>>, vector<1x256x1xf32>
      %24 = vector.shape_cast %23 : vector<1x256x1xf32> to vector<256x1xf32>
      %25 = arith.negf %21 : vector<256x128xf32>
      %26 = math.exp %25 : vector<256x128xf32>
      %cst_12 = arith.constant 1.000000e+00 : f32
      %27 = vector.broadcast %cst_12 : f32 to vector<256x128xf32>
      %28 = arith.addf %27, %26 : vector<256x128xf32>
      %29 = arith.divf %27, %28 : vector<256x128xf32>
      %30 = arith.mulf %21, %29 : vector<256x128xf32>
      %31 = arith.mulf %30, %22 : vector<256x128xf32>
      %32 = vector.broadcast %24 : vector<256x1xf32> to vector<256x128xf32>
      %33 = arith.mulf %31, %32 : vector<256x128xf32>
      %c0_13 = arith.constant 0 : index
      %c0_14 = arith.constant 0 : index
      %34 = vector.load %arg11[%c0_13, %c0_14] : memref<256x256xf32, #tpu.memory_space<vmem>>, vector<256x256xf32>
      %35 = arith.truncf %33 : vector<256x128xf32> to vector<256x128xbf16>
      %c0_15 = arith.constant 0 : index
      %c0_16 = arith.constant 0 : index
      %c0_17 = arith.constant 0 : index
      %36 = vector.load %arg8[%c0_15, %c0_16, %c0_17] : memref<1x128x256xbf16, #tpu.memory_space<vmem>>, vector<1x128x256xbf16>
      %37 = vector.shape_cast %36 : vector<1x128x256xbf16> to vector<128x256xbf16>
      %cst_18 = arith.constant dense<0.000000e+00> : vector<256x256xf32>
      %38 = tpu.matmul %35, %37, %cst_18 {dimension_numbers = #tpu.dot_dimension_numbers<[1], [0], [0], [1], [0, 0, 1, 1], [], []>} : vector<256x128xbf16>, vector<128x256xbf16>, vector<256x256xf32> -> vector<256x256xf32>
      %39 = arith.addf %34, %38 : vector<256x256xf32>
      %c0_19 = arith.constant 0 : index
      %c0_20 = arith.constant 0 : index
      %40 = vector.load %arg11[%c0_19, %c0_20] : memref<256x256xf32, #tpu.memory_space<vmem>>, vector<256x256xf32>
      tpu.vector_store %arg11[%c0_19, %c0_20], %39 {strides = array<i32>} : memref<256x256xf32, #tpu.memory_space<vmem>>, vector<256x256xf32>,
    } else {
    }
    %c31_i32 = arith.constant 31 : i32
    %12 = arith.cmpi eq, %arg1, %c31_i32 : i32
    %c1_i32 = arith.constant 1 : i32
    %13 = arith.cmpi eq, %arg2, %c1_i32 : i32
    %14 = arith.andi %12, %13 : i1
    %15 = arith.extui %14 : i1 to i32
    %c0_i32_4 = arith.constant 0 : i32
    %16 = arith.cmpi ne, %15, %c0_i32_4 : i32
    scf.if %16 {
      %c0 = arith.constant 0 : index
      %c0_5 = arith.constant 0 : index
      %17 = vector.load %arg11[%c0, %c0_5] : memref<256x256xf32, #tpu.memory_space<vmem>>, vector<256x256xf32>
      %18 = arith.truncf %17 : vector<256x256xf32> to vector<256x256xbf16>
      %c0_6 = arith.constant 0 : index
      %c0_7 = arith.constant 0 : index
      %19 = vector.load %arg10[%c0_6, %c0_7] : memref<256x256xbf16, #tpu.memory_space<vmem>>, vector<256x256xbf16>
      tpu.vector_store %arg10[%c0_6, %c0_7], %18 {strides = array<i32>} : memref<256x256xbf16, #tpu.memory_space<vmem>>, vector<256x256xbf16>,
    } else {
    }
    return
  }
  func.func @transform_0(%arg0: i32, %arg1: i32, %arg2: i32, %arg3: memref<128xi32, #tpu.memory_space<smem>>, %arg4: memref<64xi32, #tpu.memory_space<smem>>, %arg5: memref<64xi32, #tpu.memory_space<smem>>) -> (i32, i32) {
    %c0_i32 = arith.constant 0 : i32
    %c0_i32_0 = arith.constant 0 : i32
    return %arg0, %c0_i32 : i32, i32
  }
  func.func @transform_1(%arg0: i32, %arg1: i32, %arg2: i32, %arg3: memref<128xi32, #tpu.memory_space<smem>>, %arg4: memref<64xi32, #tpu.memory_space<smem>>, %arg5: memref<64xi32, #tpu.memory_space<smem>>) -> (i32, i32, i32) {
    %c32_i32 = arith.constant 32 : i32
    %0 = arith.muli %arg0, %c32_i32 : i32
    %1 = arith.addi %0, %arg1 : i32
    %c2_i32 = arith.constant 2 : i32
    %2 = arith.muli %1, %c2_i32 : i32
    %3 = arith.addi %2, %arg2 : i32
    %4 = arith.index_cast %3 : i32 to index
    %5 = memref.load %arg3[%4] : memref<128xi32, #tpu.memory_space<smem>>
    %c0_i32 = arith.constant 0 : i32
    %c0_i32_0 = arith.constant 0 : i32
    %c0_i32_1 = arith.constant 0 : i32
    return %5, %c0_i32, %c0_i32_0 : i32, i32, i32
  }
  func.func @transform_2(%arg0: i32, %arg1: i32, %arg2: i32, %arg3: memref<128xi32, #tpu.memory_space<smem>>, %arg4: memref<64xi32, #tpu.memory_space<smem>>, %arg5: memref<64xi32, #tpu.memory_space<smem>>) -> (i32, i32, i32) {
    %c32_i32 = arith.constant 32 : i32
    %0 = arith.muli %arg0, %c32_i32 : i32
    %1 = arith.addi %0, %arg1 : i32
    %c2_i32 = arith.constant 2 : i32
    %2 = arith.muli %1, %c2_i32 : i32
    %3 = arith.addi %2, %arg2 : i32
    %4 = arith.index_cast %3 : i32 to index
    %5 = memref.load %arg3[%4] : memref<128xi32, #tpu.memory_space<smem>>
    %c0_i32 = arith.constant 0 : i32
    %c0_i32_0 = arith.constant 0 : i32
    %c0_i32_1 = arith.constant 0 : i32
    return %5, %c0_i32, %c0_i32_0 : i32, i32, i32
  }
  func.func @transform_3(%arg0: i32, %arg1: i32, %arg2: i32, %arg3: memref<128xi32, #tpu.memory_space<smem>>, %arg4: memref<64xi32, #tpu.memory_space<smem>>, %arg5: memref<64xi32, #tpu.memory_space<smem>>) -> (i32, i32, i32) {
    %c32_i32 = arith.constant 32 : i32
    %0 = arith.muli %arg0, %c32_i32 : i32
    %1 = arith.addi %0, %arg1 : i32
    %2 = arith.index_cast %1 : i32 to index
    %3 = memref.load %arg5[%2] : memref<64xi32, #tpu.memory_space<smem>>
    %c0_i32 = arith.constant 0 : i32
    %c0_i32_0 = arith.constant 0 : i32
    return %3, %arg0, %c0_i32 : i32, i32, i32
  }
  func.func @transform_4(%arg0: i32, %arg1: i32, %arg2: i32, %arg3: memref<128xi32, #tpu.memory_space<smem>>, %arg4: memref<64xi32, #tpu.memory_space<smem>>, %arg5: memref<64xi32, #tpu.memory_space<smem>>) -> (i32, i32) {
    %c0_i32 = arith.constant 0 : i32
    %c0_i32_0 = arith.constant 0 : i32
    return %arg0, %c0_i32 : i32, i32
  }
}

</mosaic_0001>

<bundles_post_ra>
// kernel: tpu_custom_call.1
= control target key start
LH: loop header
LB: loop body
LE: loop exit
PB: predicated region body
PF: predicated region fallthrough
CT: control target
= control target key end

     0   :  { %s4226_s0 = inlined_call_operand.vmem [shape: s32[128], index: 0, kind: input, shape index: {}]   ;;  %s4227_s3 = inlined_call_operand.hbm [shape: bf16[512,256], index: 3, kind: input, shape index: {}]   ;;  %s4228_s4 = inlined_call_operand.vmem [shape: bf16[64,256,256], index: 4, kind: input, shape index: {}]   ;;  %s4229_s5 = inlined_call_operand.hbm [shape: bf16[64,128,256], index: 5, kind: input, shape index: {}]   ;;  %s4230_s6 = inlined_call_operand.vmem [shape: f32[32,512,1], index: 6, kind: input, shape index: {}]   ;;  %s4231_s7 = inlined_call_operand.hbm [shape: bf16[512,256], index: 7, kind: output, shape index: {}]   ;;  %s4232_s1 = inlined_call_operand.vmem [shape: s32[64], index: 1, kind: input, shape index: {}]   ;;  %s4233_s2 = inlined_call_operand.vmem [shape: s32[64], index: 2, kind: input, shape index: {}]  }
   0x1   :  { %4252 = sst [smem:[#allocation28_spill]] %s4227_s3  ;;  %s12_s26 = sshll.u32 %s4226_s0, 4  ;;  %s13_s26 = int_to_ptr.vmem [resolvable:$true] %s12_s26 }
   0x2   :  { %4253 = sst [smem:[#allocation29_spill]] %s4228_s4  ;;  %s16_s29 = sshll.u32 %s4232_s1, 4  ;;  %s17_s29 = int_to_ptr.vmem [resolvable:$true] %s16_s29 }
   0x3   :  { %4254 = sst [smem:[#allocation30_spill]] %s4229_s5  ;;  %s3122_s30 = scalar_lea.vmem %s13_s26, 16 }
   0x4   :  { %4255 = sst [smem:[#allocation31_spill]] %s4230_s6  ;;  %p3123_p0 = scmp.ne.s32.totalorder %s13_s26, %s3122_s30 }
   0x5   :  { %4256 = sst [smem:[#allocation32_spill]] %s4231_s7  ;;  %p3127_p1 = scmp.lt.s32.totalorder %s13_s26, %s13_s26 }
   0x6   :  { %p3128_p2 = scmp.lt.s32.totalorder %s3122_s30, %s3122_s30 }
   0x8   :  { %p3129_p3 = por %p3128_p2, %p3127_p1 }
   0xa   :  { %p3130_p4 = pnand %p3129_p3, %p3123_p0 }
   0xc   :  { %3133 = shalt.err (!%p3130_p4)  }
   0xd   :  { %s3364_s8 = smov [#allocation4]   ;;  %s3134_s9 = scalar_lea.vmem %s17_s29, 16 }
   0xe   :  { %15 = dma.vmem_to_smem %s13_s26, 16, %s3364_s8, [#allocation3] }
   0xf   :  { %p3135_p5 = scmp.ne.s32.totalorder %s17_s29, %s3134_s9  ;;  %p3139_p6 = scmp.lt.s32.totalorder %s17_s29, %s17_s29 }
  0x10   :  { %p3140_p7 = scmp.lt.s32.totalorder %s3134_s9, %s3134_s9 }
  0x12   :  { %p3141_p8 = por %p3140_p7, %p3139_p6 }
  0x14   :  { %p3142_p9 = pnand %p3141_p8, %p3135_p5 }
  0x16   :  { %3145 = shalt.err (!%p3142_p9)  }
  0x17   :  { %s3365_s0 = smov [#allocation5]   ;;  %s20_s11 = sshll.u32 %s4233_s2, 4  ;;  %s21_s11 = int_to_ptr.vmem [resolvable:$true] %s20_s11 }
  0x18   :  { %19 = dma.vmem_to_smem %s17_s29, 16, %s3365_s0, [#allocation3] }
  0x19   :  { %s3146_s12 = scalar_lea.vmem %s21_s11, 16  ;;  %p3151_p11 = scmp.lt.s32.totalorder %s21_s11, %s21_s11 }
  0x1a   :  { %p3147_p10 = scmp.ne.s32.totalorder %s21_s11, %s3146_s12  ;;  %p3152_p12 = scmp.lt.s32.totalorder %s3146_s12, %s3146_s12 }
  0x1c   :  { %p3153_p13 = por %p3152_p12, %p3151_p11 }
  0x1e   :  { %p3154_p0 = pnand %p3153_p13, %p3147_p10 }
  0x20   :  { %3157 = shalt.err (!%p3154_p0)  }
  0x21   :  { %s3366_s13 = smov [#allocation6]  }
  0x22   :  { %23 = dma.vmem_to_smem %s21_s11, 16, %s3366_s13, [#allocation3] }
  0x23   :  { %3298 = dma.done.wait [#allocation3], 48 }
  0x24   :  { %3299 = vsyncadd [#allocation3], 4294967248 }
  0x25   :  { %25 = sfence }
  0x26   :  { %26 = vsyncpa [#allocation8], 0 }
  0x27   :  { %28 = vsyncpa [#allocation8 + $0x1], 0 }
  0x28   :  { %29 = vsyncpa [#allocation11], 0 }
  0x29   :  { %31 = vsyncpa [#allocation11 + $0x1], 0 }
  0x2a   :  { %32 = vsyncpa [#allocation9], 0 }
  0x2b   :  { %34 = vsyncpa [#allocation9 + $0x1], 0  ;;  %s3425_s2 = smov 0   ;;  %s3427_s14 = smov 0  }
  0x2c   :  { %s3429_s15 = smov 0   ;;  %s3431_s16 = smov 0  }
  0x2d   :  { %s3433_s17 = smov 0   ;;  %s3435_s18 = smov 0  }
  0x2e   :  { %s3437_s19 = smov 0   ;;  %s3439_s20 = smov 0  }
  0x2f   :  { %s3441_s21 = smov 0   ;;  %s3443_s22 = smov 0  }
  0x30   :  { %s3445_s23 = smov 0   ;;  %s3447_s24 = smov 0  }
  0x31   :  { %s3449_s25 = smov 0  }
  0x32 LB: > { %4257 = sst [smem:[#allocation19_spill]] %s3326_s16  ;;  %s2511_s26 = sadd.s32 4294967295, %s3362_s25   ;;  %s3362_s25 = sphi %s3449_s25, %s40_s25   ;;  %s3358_s24 = sphi %s3447_s24, %s4310_s24   ;;  %s3354_s23 = sphi %s3445_s23, %s4300_s23   ;;  %s3350_s22 = sphi %s3443_s22, %s4309_s22   ;;  %s3346_s21 = sphi %s3441_s21, %s4308_s21   ;;  %s3342_s20 = sphi %s3439_s20, %s4298_s20   ;;  %s3338_s19 = sphi %s3437_s19, %s4297_s19   ;;  %s3334_s18 = sphi %s3435_s18, %s4307_s18   ;;  %s3330_s17 = sphi %s3433_s17, %s4306_s17   ;;  %s3326_s16 = sphi %s3431_s16, %s4305_s16   ;;  %s3322_s15 = sphi %s3429_s15, %s4304_s15   ;;  %s3318_s14 = sphi %s3427_s14, %s4303_s14   ;;  %s3314_s2 = sphi %s3425_s2, %s4302_s2  }
  0x33   : > { %4258 = sst [smem:[#allocation20_spill]] %s3338_s19  ;;  %s2512_s27 = sadd.s32 4294967294, %s3362_s25  }
  0x34   : > { %4259 = sst [smem:[#allocation21_spill]] %s3350_s22  ;;  %p73_p1 = scmp.ne.s32.totalorder %s3334_s18, %s3330_s17 }
  0x35   : > { %4260 = sst [smem:[#allocation22_spill]] %s3354_s23  ;;  %p4237_p2 = scmp.eq.s32.totalorder %s3362_s25, 0 }
  0x36   : > { %p79_p3 = scmp.ne.s32.totalorder %s3330_s17, %s3326_s16  ;;  %p3497_p4 = scmp.eq.s32.totalorder %s2511_s26, 0 }
  0x37   : > { %p3503_p5 = por %p4237_p2, %p73_p1  ;;  %p209_p6 = scmp.eq.s32.totalorder %s2511_s26, 127 }
  0x38   : > { %p3509_p7 = por %p3497_p4, %p79_p3  ;;  %p215_p8 = scmp.eq.s32.totalorder %s2512_s27, 127 }
  0x39   : > { %p3513_p9 = por %p209_p6, %p73_p1  ;;  %p4236_p11 = scmp.lt.s32.totalorder %s3362_s25, 128 }
  0x3a   : > { %s4263_s30 = scalar_select %p3509_p7, 1, 0 }
  0x3b   : > { %s4264_s8 = scalar_select %p3513_p9, 1, 0 }
  0x3c   : > { %p3517_p10 = por %p215_p8, %p79_p3  ;;  %s235_s0 = sand.u32 1, %s3334_s18  }
  0x3d   : > { %4265 = sst [smem:[#allocation23_spill]] %s4264_s8  ;;  %s2699_s1 = sshll.u32 %s3358_s24, 12 }
  0x3e   : > { %s4266_s9 = scalar_select %p3517_p10, 1, 0 }
  0x3f   : > { %s2525_s10 = sshll.u32 %s235_s0, 8  ;;  %s4268_s3 = sld [smem:[#allocation28_spill]] }
  0x40   : > { %4267 = sst [smem:[#allocation24_spill]] %s4266_s9  ;;  %s239_s26 = scalar_lea.vmem [#allocation7], %s2525_s10 }
  0x41   : > { %s247_s27 = sshll.u32 %s239_s26, 4  ;;  %p3533_p12 = pnand %p4236_p11, %p3503_p5  ;;  %s3537_s27 = int_to_ptr.vmem [resolvable:$true] %s247_s27 }
  0x42   : > { %s3539_s9 = scalar_lea.sflag [#allocation8], %s235_s0 }
  0x43   : > { %p3160_p0 = pneg %p3533_p12 }
  0x45   : > { %s3527_s13 = scalar_lea.hbm %s4268_s3, %s2699_s1  ;;  %s3163_s11 = scalar_lea.hbm %s4268_s3, 8192 }
  0x46   : > { %s3158_s1 = scalar_lea.hbm %s3527_s13, 4096  ;;  %p3164_p5 = scmp.lt.u32.totalorder %s3527_s13, %s4268_s3 }
  0x47   : > { %p3159_p13 = scmp.ne.s32.totalorder %s3527_s13, %s3158_s1  ;;  %p3165_p6 = scmp.lt.u32.totalorder %s3163_s11, %s3158_s1 }
  0x48   : > { %p3167_p11 = scmp.lt.u32.totalorder %s3158_s1, %s3527_s13 }
  0x49   : > { %p3161_p1 = pnand %p3160_p0, %p3159_p13  ;;  %p3166_p8 = por %p3165_p6, %p3164_p5 }
  0x4b   : > { %p3162_p3 = pneg %p3161_p1  ;;  %p3168_p2 = por %p3167_p11, %p3166_p8 }
  0x4d   : > { %p3169_p10 = pnand %p3168_p2, %p3162_p3 }
  0x4f   : > { %3172 = shalt.err (!%p3169_p10)
}
  0x50   : > { %s3173_s0 = scalar_lea.vmem %s3537_s27, 4096  ;;  %s3367_s29 = smov [#allocation7]  }
  0x51   : > { %p3174_p13 = scmp.ne.s32.totalorder %s3537_s27, %s3173_s0  ;;  %s3178_s10 = sshll.u32 %s3367_s29, 4  ;;  %s3179_s10 = int_to_ptr.vmem [resolvable:$false] %s3178_s10 }
  0x52   : > { %s3180_s12 = scalar_lea.vmem %s3179_s10, 8192  ;;  %p3181_p7 = scmp.lt.s32.totalorder %s3537_s27, %s3179_s10 }
  0x53   : > { %p3176_p1 = pnand %p3174_p13, %p3160_p0  ;;  %p3182_p5 = scmp.lt.s32.totalorder %s3180_s12, %s3173_s0 }
  0x55   : > { %p3177_p9 = pneg %p3176_p1  ;;  %p3183_p6 = por %p3182_p5, %p3181_p7 }
  0x57   : > { %p3184_p11 = pnand %p3183_p6, %p3177_p9 }
  0x59   : > { %3187 = shalt.err (!%p3184_p11)
}
  0x5a   : > { %s4240_s1 = smov 128   ;;  %s4241_s11 = smov 8  }
  0x5b   : > { %2747 = dma.hbm_to_vmem [thread:$0]  (!%p3533_p12), %s3527_s13, 4096, %s3537_s27, %s3539_s9, %s4240_s1, %s4240_s1, %s4241_s11  }
  0x5c   : > { %p2534_p2 = scmp.ge.s32.totalorder %s3362_s25, 1  ;;  %p318_p7 = scmp.lt.s32.totalorder %s3362_s25, 129 }
  0x5d   : > { %s59_s26 = sadd.s32 1, %s3358_s24  ;;  %s66_s29 = sadd.s32 1, %s3334_s18 }
  0x5e   : > { %p3573_p9 = pnand %p2534_p2, %p318_p7  ;;  %s52_s16 = sadd.s32 1, %s3350_s22 }
  0x5f   : > { %p53_p10 = scmp.ge.s32.totalorder %s52_s16, 2  ;;  %s55_s10 = sadd.s32 1, %s3354_s23 }
  0x60   : > { %s2517_s9 = sshll.u32 %s3358_s24, 5  ;;  %p145_p0 = scmp.ne.s32.totalorder %s3322_s15, %s3318_s14 }
  0x61   : > { %s4312_s16 = smov (%p53_p10, %s52_s16), 0  ;;  %s4314_s10 = smov (!%p53_p10, %s55_s10), %s3354_s23 }
  0x62   : > { %4271 = sst [smem:[#allocation25_spill]] %s4312_s16  ;;  %s126_s13 = sadd.s32 %s3354_s23, %s2517_s9 }
  0x63   : > { %p57_p12 = scmp.ge.s32.totalorder %s4314_s10, 32  ;;  %s2518_s27 = sshll.u32 %s126_s13, 1 }
  0x64   : > { %p151_p3 = scmp.ne.s32.totalorder %s3318_s14, %s3314_s2  ;;  %s138_s12 = sadd.s32 1, %s3322_s15 }
  0x65   : > { %s4316_s10 = smov (%p57_p12, %s4314_s10), 0  ;;  %s4318_s26 = smov (!%p57_p12, %s59_s26), %s3358_s24 }
  0x66   : > { %4272 = sst [smem:[#allocation26_spill]] %s4316_s10  ;;  %p61_p8 = scmp.ge.s32.totalorder %s4318_s26, 2 }
  0x67   : > { %s128_s1 = sadd.s32 %s3350_s22, %s2518_s27  ;;  %p3596_p13 = por %p151_p3, %p3497_p4 }
  0x68   : > { %s4320_s26 = smov (%p61_p8, %s4318_s26), 0  ;;  %p4275_p1 = scmp.eq.s32.totalorder %s3362_s25, 0 }
  0x69   : > { %s4273_s11 = scalar_select %p3596_p13, 1, 0 }
  0x6a   : > { %4274 = sst [smem:[#allocation27_spill]] %s4320_s26  ;;  %p3604_p5 = por %p145_p0, %p4275_p1 }
  0x6b   : > { %s275_s2 = sand.u32 1, %s3322_s15   ;;  %s63_s28 = ssub.s32 %s3358_s24, %s4320_s26 }
  0x6c   : > { %s2519_s13 = sshll.u32 %s4320_s26, 5  ;;  %p64_p4 = scmp.eq.s32.totalorder %s63_s28, 0 }
  0x6d   : > { %s131_s27 = sadd.s32 %s2519_s13, %s4316_s10  ;;  %s129_s3 = sld [smem:[#allocation4 + %s128_s1]] }
  0x6e   : > { %s2520_s23 = sshll.u32 %s131_s27, 1  ;;  %s2529_s8 = sshll.u32 %s275_s2, 7 }
  0x6f   : > { %s3614_s22 = scalar_select %p64_p4, %s3334_s18, %s66_s29  }
  0x70   : > { %s133_s7 = sadd.s32 %s2520_s23, %s4312_s16  ;;  %p4277_p6 = scmp.lt.s32.totalorder %s3362_s25, 128 }
  0x71   : > { %s134_s6 = sld [smem:[#allocation4 + %s133_s7]]  ;;  %s4322_s1 = smov (!%p3604_p5, %s128_s1), 0 }
  0x72   : > { %p3621_p11 = pnand %p4277_p6, %p3604_p5  ;;  %p4279_p2 = pmov %p4277_p6 }
  0x73   : > { %s2737_s19 = scalar_select %p3604_p5, [#allocation4], [#allocation13] }
  0x74   : > { %p4280_p7 = pmov %p4279_p2  ;;  %s279_s7 = scalar_lea.vmem [#allocation10], %s2529_s8 }
  0x75   : > { %s4324_s19 = smov (!%p4279_p2, %s2737_s19), [#allocation14]  ;;  %s291_s28 = sshll.u32 %s279_s7, 4  ;;  %s3636_s28 = int_to_ptr.vmem [resolvable:$true] %s291_s28 }
  0x76   : > { %s4326_s1 = smov (!%p4280_p7, %s4322_s1), 0  ;;  %s4281_s5 = sld [smem:[#allocation30_spill]] }
  0x77   : > { %s135_s29 = ssub.s32 %s129_s3, %s134_s6  ;;  %s284_s23 = sld [smem:[%s4324_s19 + %s4326_s1]] }
  0x78   : > { %p136_p10 = scmp.eq.s32.totalorder %s135_s29, 0  ;;  %s3643_s16 = scalar_lea.sflag [#allocation11], %s275_s2 }
  0x79   : > { %p3190_p0 = pneg %p3621_p11 }
  0x7a   : > { %s3634_s13 = scalar_select %p136_p10, %s3322_s15, %s138_s12  }
  0x7c   : > { %s3193_s8 = scalar_lea.hbm %s4281_s5, 131072 }
  0x7d   : > { %s2700_s27 = sshll.u32 %s284_s23, 11 }
  0x7e   : > { %s3641_s9 = scalar_lea.hbm %s4281_s5, %s2700_s27 }
  0x7f   : > { %s3188_s3 = scalar_lea.hbm %s3641_s9, 2048  ;;  %p3194_p1 = scmp.lt.u32.totalorder %s3641_s9, %s4281_s5 }
  0x80   : > { %p3189_p12 = scmp.ne.s32.totalorder %s3641_s9, %s3188_s3  ;;  %p3195_p5 = scmp.lt.u32.totalorder %s3193_s8, %s3188_s3 }
  0x81   : > { %p3197_p6 = scmp.lt.u32.totalorder %s3188_s3, %s3641_s9 }
  0x82   : > { %p3191_p3 = pnand %p3190_p0, %p3189_p12  ;;  %p3196_p4 = por %p3195_p5, %p3194_p1 }
  0x84   : > { %p3192_p8 = pneg %p3191_p3  ;;  %p3198_p2 = por %p3197_p6, %p3196_p4 }
  0x86   : > { %p3199_p7 = pnand %p3198_p2, %p3192_p8 }
  0x88   : > { %3202 = shalt.err (!%p3199_p7)
}
  0x89   : > { %s3203_s10 = scalar_lea.vmem %s3636_s28, 2048  ;;  %s3370_s12 = smov [#allocation10]  }
  0x8a   : > { %p3204_p10 = scmp.ne.s32.totalorder %s3636_s28, %s3203_s10  ;;  %s3208_s2 = sshll.u32 %s3370_s12, 4  ;;  %s3209_s2 = int_to_ptr.vmem [resolvable:$false] %s3208_s2 }
  0x8b   : > { %s3210_s29 = scalar_lea.vmem %s3209_s2, 4096  ;;  %p3211_p13 = scmp.lt.s32.totalorder %s3636_s28, %s3209_s2 }
  0x8c   : > { %p3206_p12 = pnand %p3204_p10, %p3190_p0  ;;  %p3212_p1 = scmp.lt.s32.totalorder %s3210_s29, %s3203_s10 }
  0x8e   : > { %p3207_p3 = pneg %p3206_p12  ;;  %p3213_p5 = por %p3212_p1, %p3211_p13 }
  0x90   : > { %p3214_p4 = pnand %p3213_p5, %p3207_p3 }
  0x92   : > { %3217 = shalt.err (!%p3214_p4)
}
  0x93   : > { %s4282_s23 = smov 8   ;;  %s4283_s7 = smov 128  }
  0x94   : > { %2752 = dma.hbm_to_vmem [thread:$0]  (!%p3621_p11), %s3641_s9, 2048, %s3636_s28, %s3643_s16, %s4283_s7, %s4283_s7, %s4282_s23  }
  0x95   : > { %322 = sbr.rel (%p3573_p9) target bundleno = 926 (0x39e), region = 36  ;;  %s3677_s27 = sand.u32 (!%p3573_p9), 1, %s3330_s17  }
  0x96   : > { %s2535_s3 = sshll.u32 (!%p3573_p9), %s3677_s27, 8  ;;  %s325_s6 = scalar_lea.sflag (!%p3573_p9), [#allocation8], %s3677_s27 }
  0x97   : > { %s3683_s4 = scalar_lea.vmem (!%p3573_p9), [#allocation7], %s2535_s3  ;;  %p4284_p13 = scmp.ne.s32.totalorder (!%p3573_p9), %s4263_s30, 0 }
  0x9c   : > { %3301 = dma.done.wait (%p4284_p13), %s325_s6, 4096  }
  0x9d   : > { %3303 = vsyncadd (%p4284_p13), %s325_s6, 4294963200  ;;  %s333_s0 = sand.u32 1, %s3318_s14   ;;  %p4285_p9 = scmp.ne.s32.totalorder %s4273_s11, 0 }
  0x9e   : > { %s2536_s16 = sshll.u32 %s333_s0, 7  ;;  %s334_s28 = scalar_lea.sflag [#allocation11], %s333_s0 }
  0x9f   : > { %s3690_s9 = scalar_lea.vmem [#allocation10], %s2536_s16 }
  0xa0   : > { %3305 = dma.done.wait (%p4285_p9), %s334_s28, 2048  }
  0xa1   : > { %3307 = vsyncadd (%p4285_p9), %s334_s28, 4294965248  ;;  %s4286_s19 = sld [smem:[#allocation20_spill]]  ;;  %s2538_s8 = sshll.u32 %s3346_s21, 5 }
  0xa2   : > { %s3698_s30 = sadd.s32 %s3342_s20, %s2538_s8  ;;  %p428_p11 = scmp.eq.s32.totalorder %s3342_s20, 0 }
  0xa3   : > { %s2539_s1 = sshll.u32 %s3698_s30, 1  ;;  %s412_s26 = sld [smem:[#allocation6 + %s3698_s30]] }
  0xa4   : > { %p416_p8 = scmp.lt.s32.totalorder %s2538_s8, 63  ;;  %s4287_s6 = sld [smem:[#allocation29_spill]] }
  0xa5   : > { %s3717_s5 = scalar_lea.vmem [#allocation12], %s2535_s3 }
  0xa6   : > { %s4328_s8 = smov (!%p416_p8, %s2538_s8), 63 }
  0xa7   : > { %s393_s10 = sadd.s32 %s4286_s19, %s2539_s1  ;;  %p429_p0 = scmp.eq.s32.totalorder %s4286_s19, 0 }
  0xa8   : > { %s394_s12 = sld [smem:[#allocation4 + %s393_s10]] }
  0xa9   : > { %p430_p6 = pnand %p429_p0, %p428_p11  ;;  %p414_p2 = scmp.lt.s32.totalorder %s412_s26, 31 }
  0xaa   : > { %s4288_s10 = sld [smem:[#allocation31_spill]]  ;;  %v3371_v0 = vmov (!%p430_p6), 0.0  }
  0xab   : > { %s4330_s26 = smov (!%p414_p2, %s412_s26), 31  ;;  %434 = vst [vmem:[#allocation2] sm:$0xff] (!%p430_p6), %v3371_v0  ;;  %435 = vst [vmem:[#allocation2 + $0x8] sm:$0xff] (!%p430_p6), %v3371_v0 }
  0xac   : > { %s2544_s11 = sshll.u32 %s4330_s26, 6  ;;  %433 = sbr.rel (%p430_p6) target bundleno = 203 (0xcb), region = 48  ;;  %436 = vst [vmem:[#allocation2 + $0x10] sm:$0xff] (!%p430_p6), %v3371_v0  ;;  %437 = vst [vmem:[#allocation2 + $0x18] sm:$0xff] (!%p430_p6), %v3371_v0 }
  0xad   : > { %s419_s29 = sadd.s32 %s2544_s11, %s4328_s8  ;;  %438 = vst [vmem:[#allocation2 + $0x20] sm:$0xff] (!%p430_p6), %v3371_v0  ;;  %439 = vst [vmem:[#allocation2 + $0x28] sm:$0xff] (!%p430_p6), %v3371_v0 }
  0xae   : > { %p395_p7 = scmp.lt.s32.totalorder %s394_s12, 63  ;;  %s2545_s16 = sshll.u32 %s419_s29, 3  ;;  %440 = vst [vmem:[#allocation2 + $0x30] sm:$0xff] (!%p430_p6), %v3371_v0  ;;  %441 = vst [vmem:[#allocation2 + $0x38] sm:$0xff] (!%p430_p6), %v3371_v0 }
  0xaf   : > { %442 = vst [vmem:[#allocation2 + $0x40] sm:$0xff] (!%p430_p6), %v3371_v0  ;;  %443 = vst [vmem:[#allocation2 + $0x48] sm:$0xff] (!%p430_p6), %v3371_v0 }
  0xb0   : > { %s4332_s12 = smov (!%p395_p7, %s394_s12), 63  ;;  %s3713_s19 = scalar_lea.vmem %s4288_s10, %s2545_s16  ;;  %444 = vst [vmem:[#allocation2 + $0x50] sm:$0xff] (!%p430_p6), %v3371_v0  ;;  %445 = vst [vmem:[#allocation2 + $0x58] sm:$0xff] (!%p430_p6), %v3371_v0 }
  0xb1   : > { %s2701_s2 = sshll.u32 %s4332_s12, 8  ;;  %446 = vst [vmem:[#allocation2 + $0x60] sm:$0xff] (!%p430_p6), %v3371_v0  ;;  %447 = vst [vmem:[#allocation2 + $0x68] sm:$0xff] (!%p430_p6), %v3371_v0 }
  0xb2   : > { %s3708_s0 = scalar_lea.vmem %s4287_s6, %s2701_s2  ;;  %448 = vst [vmem:[#allocation2 + $0x70] sm:$0xff] (!%p430_p6), %v3371_v0  ;;  %449 = vst [vmem:[#allocation2 + $0x78] sm:$0xff] (!%p430_p6), %v3371_v0 }
  0xb3   : > { %450 = vst [vmem:[#allocation2 + $0x80] sm:$0xff] %v3371_v0  ;;  %451 = vst [vmem:[#allocation2 + $0x88] sm:$0xff] %v3371_v0 }
  0xb4   : > { %452 = vst [vmem:[#allocation2 + $0x90] sm:$0xff] %v3371_v0  ;;  %453 = vst [vmem:[#allocation2 + $0x98] sm:$0xff] %v3371_v0 }
  0xb5   : > { %454 = vst [vmem:[#allocation2 + $0xa0] sm:$0xff] %v3371_v0  ;;  %455 = vst [vmem:[#allocation2 + $0xa8] sm:$0xff] %v3371_v0 }
  0xb6   : > { %456 = vst [vmem:[#allocation2 + $0xb0] sm:$0xff] %v3371_v0  ;;  %457 = vst [vmem:[#allocation2 + $0xb8] sm:$0xff] %v3371_v0 }
  0xb7   : > { %458 = vst [vmem:[#allocation2 + $0xc0] sm:$0xff] %v3371_v0  ;;  %459 = vst [vmem:[#allocation2 + $0xc8] sm:$0xff] %v3371_v0 }
  0xb8   : > { %460 = vst [vmem:[#allocation2 + $0xd0] sm:$0xff] %v3371_v0  ;;  %461 = vst [vmem:[#allocation2 + $0xd8] sm:$0xff] %v3371_v0 }
  0xb9   : > { %462 = vst [vmem:[#allocation2 + $0xe0] sm:$0xff] %v3371_v0  ;;  %463 = vst [vmem:[#allocation2 + $0xe8] sm:$0xff] %v3371_v0 }
  0xba   : > { %464 = vst [vmem:[#allocation2 + $0xf0] sm:$0xff] %v3371_v0  ;;  %465 = vst [vmem:[#allocation2 + $0xf8] sm:$0xff] %v3371_v0 }
  0xbb   : > { %466 = vst [vmem:[#allocation2 + $0x100] sm:$0xff] %v3371_v0  ;;  %467 = vst [vmem:[#allocation2 + $0x108] sm:$0xff] %v3371_v0 }
  0xbc   : > { %468 = vst [vmem:[#allocation2 + $0x110] sm:$0xff] %v3371_v0  ;;  %469 = vst [vmem:[#allocation2 + $0x118] sm:$0xff] %v3371_v0 }
  0xbd   : > { %470 = vst [vmem:[#allocation2 + $0x120] sm:$0xff] %v3371_v0  ;;  %471 = vst [vmem:[#allocation2 + $0x128] sm:$0xff] %v3371_v0 }
  0xbe   : > { %472 = vst [vmem:[#allocation2 + $0x130] sm:$0xff] %v3371_v0  ;;  %473 = vst [vmem:[#allocation2 + $0x138] sm:$0xff] %v3371_v0 }
  0xbf   : > { %474 = vst [vmem:[#allocation2 + $0x140] sm:$0xff] %v3371_v0  ;;  %475 = vst [vmem:[#allocation2 + $0x148] sm:$0xff] %v3371_v0 }
  0xc0   : > { %476 = vst [vmem:[#allocation2 + $0x150] sm:$0xff] %v3371_v0  ;;  %477 = vst [vmem:[#allocation2 + $0x158] sm:$0xff] %v3371_v0 }
  0xc1   : > { %478 = vst [vmem:[#allocation2 + $0x160] sm:$0xff] %v3371_v0  ;;  %479 = vst [vmem:[#allocation2 + $0x168] sm:$0xff] %v3371_v0 }
  0xc2   : > { %480 = vst [vmem:[#allocation2 + $0x170] sm:$0xff] %v3371_v0  ;;  %481 = vst [vmem:[#allocation2 + $0x178] sm:$0xff] %v3371_v0 }
  0xc3   : > { %482 = vst [vmem:[#allocation2 + $0x180] sm:$0xff] %v3371_v0  ;;  %483 = vst [vmem:[#allocation2 + $0x188] sm:$0xff] %v3371_v0 }
  0xc4   : > { %484 = vst [vmem:[#allocation2 + $0x190] sm:$0xff] %v3371_v0  ;;  %485 = vst [vmem:[#allocation2 + $0x198] sm:$0xff] %v3371_v0 }
  0xc5   : > { %486 = vst [vmem:[#allocation2 + $0x1a0] sm:$0xff] %v3371_v0  ;;  %487 = vst [vmem:[#allocation2 + $0x1a8] sm:$0xff] %v3371_v0 }
  0xc6   : > { %488 = vst [vmem:[#allocation2 + $0x1b0] sm:$0xff] %v3371_v0  ;;  %489 = vst [vmem:[#allocation2 + $0x1b8] sm:$0xff] %v3371_v0 }
  0xc7   : > { %490 = vst [vmem:[#allocation2 + $0x1c0] sm:$0xff] %v3371_v0  ;;  %491 = vst [vmem:[#allocation2 + $0x1c8] sm:$0xff] %v3371_v0 }
  0xc8   : > { %492 = vst [vmem:[#allocation2 + $0x1d0] sm:$0xff] %v3371_v0  ;;  %493 = vst [vmem:[#allocation2 + $0x1d8] sm:$0xff] %v3371_v0 }
  0xc9   : > { %494 = vst [vmem:[#allocation2 + $0x1e0] sm:$0xff] %v3371_v0  ;;  %495 = vst [vmem:[#allocation2 + $0x1e8] sm:$0xff] %v3371_v0 }
  0xca   : > { %496 = vst [vmem:[#allocation2 + $0x1f0] sm:$0xff] %v3371_v0  ;;  %497 = vst [vmem:[#allocation2 + $0x1f8] sm:$0xff] %v3371_v0 }
  0xcb PF: > { %s500_s3 = sld [smem:[#allocation5 + %s3698_s30]] }
  0xd1   : > { %p2547_p10 = scmp.le.s32.totalorder %s500_s3, 0 }
  0xd2   : > { %v2874_v1 = vld [vmem:[%s3708_s0 + $0x4] ss:$8 sps:$4 sm:$0xff] (!%p2547_p10)   ;;  %v2876_v2 = vld [vmem:[%s3708_s0] ss:$8 sps:$4 sm:$0xff] (!%p2547_p10)   ;;  %v3372_v3 = vmov (!%p2547_p10), 0   ;;  %v1084_v24 = vld [vmem:[%s3713_s19 + $0x10] sm:$0xff] (!%p2547_p10) }
  0xd3   : > { %504 = sbr.rel (%p2547_p10) target bundleno = 862 (0x35e), region = 52  ;;  %2872 = vset.pattern.permute.xlu0 (!%p2547_p10), %v3372_v3  ;;  %2873 = vset.pattern.permute.xlu1 (!%p2547_p10), %v3372_v3  ;;  %v2877_v4 = vld [vmem:[%s3708_s0 + $0x14] ss:$8 sps:$4 sm:$0xff] (!%p2547_p10)   ;;  %v2879_v5 = vld [vmem:[%s3708_s0 + $0x10] ss:$8 sps:$4 sm:$0xff] (!%p2547_p10)   ;;  %v1082_v20 = vld [vmem:[%s3713_s19] sm:$0xff] (!%p2547_p10) }
  0xd4   : > { %889 = vmatprep.subr.bf16.mxu0 (!%p2547_p10), %v2874_v1  ;;  %1770 = vmatprep.mubr.bf16.mxu1 (!%p2547_p10), %v3372_v3  ;;  %v2880_v6 = vld [vmem:[%s3708_s0 + $0x24] ss:$8 sps:$4 sm:$0xff] (!%p2547_p10)   ;;  %v2882_v7 = vld [vmem:[%s3708_s0 + $0x20] ss:$8 sps:$4 sm:$0xff] (!%p2547_p10)   ;;  %v2883_v8 = vld [vmem:[%s3708_s0 + $0x34] ss:$8 sps:$4 sm:$0xff] (!%p2547_p10)  }
  0xd5   : > { %890 = vmatpush1.bf16.msra.mxu0 (!%p2547_p10), %v2876_v2  ;;  %v2885_v9 = vld [vmem:[%s3708_s0 + $0x30] ss:$8 sps:$4 sm:$0xff] (!%p2547_p10)   ;;  %v2886_v10 = vld [vmem:[%s3708_s0 + $0x44] ss:$8 sps:$4 sm:$0xff] (!%p2547_p10)   ;;  %v2888_v11 = vld [vmem:[%s3708_s0 + $0x40] ss:$8 sps:$4 sm:$0xff] (!%p2547_p10)   ;;  %1372 = vperm.xlu0 (!%p2547_p10), %2872, %v1082_v20  }
  0xd6   : > { %891 = vmatprep.subr.bf16.mxu0 (!%p2547_p10), %v2877_v4  ;;  %v2889_v12 = vld [vmem:[%s3708_s0 + $0x54] ss:$8 sps:$4 sm:$0xff] (!%p2547_p10)   ;;  %v2891_v13 = vld [vmem:[%s3708_s0 + $0x50] ss:$8 sps:$4 sm:$0xff] (!%p2547_p10)   ;;  %v2892_v14 = vld [vmem:[%s3708_s0 + $0x64] ss:$8 sps:$4 sm:$0xff] (!%p2547_p10)   ;;  %1382 = vperm.xlu1 (!%p2547_p10), %2873, %v1084_v24  }
  0xd7   : > { %v2924_v15 = vld [vmem:[%s3683_s4 + $0x4] ss:$8 sps:$4 sm:$0xff] (!%p2547_p10)   ;;  %v2894_v16 = vld [vmem:[%s3708_s0 + $0x60] ss:$8 sps:$4 sm:$0xff] (!%p2547_p10)   ;;  %v2895_v17 = vld [vmem:[%s3708_s0 + $0x74] ss:$8 sps:$4 sm:$0xff] (!%p2547_p10)  }
  0xd8   : > { %921 = vmatprep.mubr.bf16.mxu0 (!%p2547_p10), %v2924_v15  ;;  %v2897_v18 = vld [vmem:[%s3708_s0 + $0x70] ss:$8 sps:$4 sm:$0xff] (!%p2547_p10)   ;;  %v2898_v19 = vld [vmem:[%s3708_s0 + $0x84] ss:$8 sps:$4 sm:$0xff] (!%p2547_p10)   ;;  %v2900_v21 = vld [vmem:[%s3708_s0 + $0x80] ss:$8 sps:$4 sm:$0xff] (!%p2547_p10)  }
  0xd9   : > { %892 = vmatpush1.bf16.msra.mxu0 (!%p2547_p10), %v2879_v5  ;;  %v2901_v22 = vld [vmem:[%s3708_s0 + $0x94] ss:$8 sps:$4 sm:$0xff] (!%p2547_p10)   ;;  %v1083_v23 = vld [vmem:[%s3713_s19 + $0x8] sm:$0xff] (!%p2547_p10)  ;;  %v2903_v26 = vld [vmem:[%s3708_s0 + $0x90] ss:$8 sps:$4 sm:$0xff] (!%p2547_p10)  }
  0xda   : > { %893 = vmatprep.subr.bf16.mxu0 %v2880_v6  ;;  %v1085_v25 = vld [vmem:[%s3713_s19 + $0x18] sm:$0xff]  ;;  %v2904_v27 = vld [vmem:[%s3708_s0 + $0xa4] ss:$8 sps:$4 sm:$0xff]   ;;  %1377 = vperm.xlu0 %2872, %v1083_v23   ;;  %v2906_v30 = vld [vmem:[%s3708_s0 + $0xa0] ss:$8 sps:$4 sm:$0xff]  }
  0xdb   : > { %v1086_v28 = vld [vmem:[%s3713_s19 + $0x20] sm:$0xff]  ;;  %1387 = vperm.xlu1 %2873, %v1085_v25   ;;  %v1087_v29 = vld [vmem:[%s3713_s19 + $0x28] sm:$0xff]  ;;  %v2907_v31 = vld [vmem:[%s3708_s0 + $0xb4] ss:$8 sps:$4 sm:$0xff]  }
  0xdc   : > { %v1088_v32 = vld [vmem:[%s3713_s19 + $0x30] sm:$0xff]  ;;  %v1089_v33 = vld [vmem:[%s3713_s19 + $0x38] sm:$0xff]  ;;  %v2910_v35 = vld [vmem:[%s3708_s0 + $0xc4] ss:$8 sps:$4 sm:$0xff]  }
  0xdd   : > { %894 = vmatpush1.bf16.msra.mxu0 %v2882_v7  ;;  %v2909_v34 = vld [vmem:[%s3708_s0 + $0xb0] ss:$8 sps:$4 sm:$0xff]   ;;  %v1090_v36 = vld [vmem:[%s3713_s19 + $0x40] sm:$0xff]  ;;  %v1091_v37 = vld [vmem:[%s3713_s19 + $0x48] sm:$0xff] }
  0xde   : > { %895 = vmatprep.subr.bf16.mxu0 %v2883_v8  ;;  %1392 = vperm.xlu0 %2872, %v1086_v28   ;;  %v2912_v38 = vld [vmem:[%s3708_s0 + $0xc0] ss:$8 sps:$4 sm:$0xff]   ;;  %v2913_v39 = vld [vmem:[%s3708_s0 + $0xd4] ss:$8 sps:$4 sm:$0xff]   ;;  %v2915_v42 = vld [vmem:[%s3708_s0 + $0xd0] ss:$8 sps:$4 sm:$0xff]  }
  0xdf   : > { %1397 = vperm.xlu1 %2873, %v1087_v29   ;;  %v1092_v40 = vld [vmem:[%s3713_s19 + $0x50] sm:$0xff]  ;;  %v1093_v41 = vld [vmem:[%s3713_s19 + $0x58] sm:$0xff]  ;;  %v2916_v43 = vld [vmem:[%s3708_s0 + $0xe4] ss:$8 sps:$4 sm:$0xff]  }
  0xe0   : > { %v1094_v44 = vld [vmem:[%s3713_s19 + $0x60] sm:$0xff]  ;;  %v1095_v46 = vld [vmem:[%s3713_s19 + $0x68] sm:$0xff]  ;;  %v2919_v47 = vld [vmem:[%s3708_s0 + $0xf4] ss:$8 sps:$4 sm:$0xff]  }
  0xe1   : > { %896 = vmatpush1.bf16.msra.mxu0 %v2885_v9  ;;  %v2918_v45 = vld [vmem:[%s3708_s0 + $0xe0] ss:$8 sps:$4 sm:$0xff]   ;;  %v1096_v48 = vld [vmem:[%s3713_s19 + $0x70] sm:$0xff]  ;;  %v1097_v49 = vld [vmem:[%s3713_s19 + $0x78] sm:$0xff] }
  0xe2   : > { %897 = vmatprep.subr.bf16.mxu0 %v2886_v10  ;;  %1402 = vperm.xlu0 %2872, %v1088_v32   ;;  %v2921_v50 = vld [vmem:[%s3708_s0 + $0xf0] ss:$8 sps:$4 sm:$0xff]   ;;  %v1098_v51 = vld [vmem:[%s3713_s19 + $0x80] sm:$0xff]  ;;  %v1099_v53 = vld [vmem:[%s3713_s19 + $0x88] sm:$0xff] }
  0xe3   : > { %1407 = vperm.xlu1 %2873, %v1089_v33   ;;  %v2922_v52 = vld [vmem:[%s3683_s4] ss:$8 sps:$4 sm:$0xff]   ;;  %v2925_v54 = vld [vmem:[%s3683_s4 + $0x14] ss:$8 sps:$4 sm:$0xff]   ;;  %v2927_v58 = vld [vmem:[%s3683_s4 + $0x10] ss:$8 sps:$4 sm:$0xff]  }
  0xe4   : > { %v1100_v55 = vld [vmem:[%s3713_s19 + $0x90] sm:$0xff]  ;;  %v1101_v56 = vld [vmem:[%s3713_s19 + $0x98] sm:$0xff]  ;;  %v1102_v57 = vld [vmem:[%s3713_s19 + $0xa0] sm:$0xff] }
  0xe5   : > { %898 = vmatpush1.bf16.msra.mxu0 %v2888_v11  ;;  %v1103_v59 = vld [vmem:[%s3713_s19 + $0xa8] sm:$0xff]  ;;  %v1104_v61 = vld [vmem:[%s3713_s19 + $0xb0] sm:$0xff]  ;;  %v1105_v62 = vld [vmem:[%s3713_s19 + $0xb8] sm:$0xff] }
  0xe6   : > { %899 = vmatprep.subr.bf16.mxu0 %v2889_v12  ;;  %1412 = vperm.xlu0 %2872, %v1090_v36   ;;  %v2928_v60 = vld [vmem:[%s3683_s4 + $0x24] ss:$8 sps:$4 sm:$0xff]   ;;  %v2930_v0 = vld [vmem:[%s3683_s4 + $0x20] ss:$8 sps:$4 sm:$0xff]   ;;  %v2931_v2 = vld [vmem:[%s3683_s4 + $0x34] ss:$8 sps:$4 sm:$0xff]  }
  0xe7   : > { %1417 = vperm.xlu1 %2873, %v1091_v37   ;;  %v1106_v63 = vld [vmem:[%s3713_s19 + $0xc0] sm:$0xff]  ;;  %v1107_v1 = vld [vmem:[%s3713_s19 + $0xc8] sm:$0xff]  ;;  %v1108_v4 = vld [vmem:[%s3713_s19 + $0xd0] sm:$0xff] }
  0xe8   : > { %v1109_v5 = vld [vmem:[%s3713_s19 + $0xd8] sm:$0xff]  ;;  %v1110_v6 = vld [vmem:[%s3713_s19 + $0xe0] sm:$0xff]  ;;  %v1111_v8 = vld [vmem:[%s3713_s19 + $0xe8] sm:$0xff] }
  0xe9   : > { %900 = vmatpush1.bf16.msra.mxu0 %v2891_v13  ;;  %v2933_v7 = vld [vmem:[%s3683_s4 + $0x30] ss:$8 sps:$4 sm:$0xff]   ;;  %v2934_v9 = vld [vmem:[%s3683_s4 + $0x44] ss:$8 sps:$4 sm:$0xff]   ;;  %v2936_v12 = vld [vmem:[%s3683_s4 + $0x40] ss:$8 sps:$4 sm:$0xff]  }
  0xea   : > { %901 = vmatprep.subr.bf16.mxu0 %v2892_v14  ;;  %1422 = vperm.xlu0 %2872, %v1092_v40   ;;  %v1112_v10 = vld [vmem:[%s3713_s19 + $0xf0] sm:$0xff]  ;;  %v1113_v11 = vld [vmem:[%s3713_s19 + $0xf8] sm:$0xff]  ;;  %v2940_v15 = vld [vmem:[%s3683_s4 + $0x64] ss:$8 sps:$4 sm:$0xff]  }
  0xeb   : > { %1427 = vperm.xlu1 %2873, %v1093_v41   ;;  %v2937_v13 = vld [vmem:[%s3683_s4 + $0x54] ss:$8 sps:$4 sm:$0xff]   ;;  %v2939_v14 = vld [vmem:[%s3683_s4 + $0x50] ss:$8 sps:$4 sm:$0xff]   ;;  %v2948_v20 = vld [vmem:[%s3683_s4 + $0x80] ss:$8 sps:$4 sm:$0xff]  }
  0xec   : > { %v2952_v23 = vld [vmem:[%s3683_s4 + $0xa4] ss:$8 sps:$4 sm:$0xff]   ;;  %v2954_v24 = vld [vmem:[%s3683_s4 + $0xa0] ss:$8 sps:$4 sm:$0xff]   ;;  %v2955_v25 = vld [vmem:[%s3683_s4 + $0xb4] ss:$8 sps:$4 sm:$0xff]  }
  0xed   : > { %902 = vmatpush1.bf16.msra.mxu0 %v2894_v16  ;;  %v2942_v16 = vld [vmem:[%s3683_s4 + $0x60] ss:$8 sps:$4 sm:$0xff]   ;;  %v2970_v28 = vld [vmem:[%s3690_s9 + $0x4] ss:$8 sps:$4 sm:$0xff]   ;;  %v2961_v33 = vld [vmem:[%s3683_s4 + $0xd4] ss:$8 sps:$4 sm:$0xff]  }
  0xee   : > { %903 = vmatprep.subr.bf16.mxu0 %v2895_v17  ;;  %1432 = vperm.xlu0 %2872, %v1094_v44   ;;  %v2943_v17 = vld [vmem:[%s3683_s4 + $0x74] ss:$8 sps:$4 sm:$0xff]   ;;  %v2972_v29 = vld [vmem:[%s3690_s9] ss:$8 sps:$4 sm:$0xff]   ;;  %v2981_v37 = vld [vmem:[%s3690_s9 + $0x30] ss:$8 sps:$4 sm:$0xff]  }
  0xef   : > { %1437 = vperm.xlu1 %2873, %v1095_v46   ;;  %1738 = vmatprep.subr.bf16.mxu1 %v2970_v28  ;;  %v2960_v32 = vld [vmem:[%s3683_s4 + $0xc0] ss:$8 sps:$4 sm:$0xff]   ;;  %v2979_v36 = vld [vmem:[%s3690_s9 + $0x34] ss:$8 sps:$4 sm:$0xff]   ;;  %v2982_v40 = vld [vmem:[%s3690_s9 + $0x44] ss:$8 sps:$4 sm:$0xff]  }
  0xf0   : > { %1739 = vmatpush1.bf16.msra.mxu1 %v2972_v29  ;;  %v2984_v41 = vld [vmem:[%s3690_s9 + $0x40] ss:$8 sps:$4 sm:$0xff]   ;;  %v2988_v46 = vld [vmem:[%s3690_s9 + $0x64] ss:$8 sps:$4 sm:$0xff]  }
  0xf1   : > { %904 = vmatpush1.bf16.msra.mxu0 %v2897_v18  ;;  %v2945_v18 = vld [vmem:[%s3683_s4 + $0x70] ss:$8 sps:$4 sm:$0xff]   ;;  %v2966_v44 = vld [vmem:[%s3683_s4 + $0xe0] ss:$8 sps:$4 sm:$0xff]  }
  0xf2   : > { %905 = vmatprep.subr.bf16.mxu0 %v2898_v19  ;;  %1442 = vperm.xlu0 %2872, %v1096_v48   ;;  %v2946_v19 = vld [vmem:[%s3683_s4 + $0x84] ss:$8 sps:$4 sm:$0xff]   ;;  %v2991_v48 = vld [vmem:[%s3690_s9 + $0x74] ss:$8 sps:$4 sm:$0xff]  }
  0xf3   : > { %1447 = vperm.xlu1 %2873, %v1097_v49   ;;  %v2993_v49 = vld [vmem:[%s3690_s9 + $0x70] ss:$8 sps:$4 sm:$0xff]  }
  0xf5   : > { %906 = vmatpush1.bf16.msra.mxu0 %v2900_v21  ;;  %v2949_v21 = vld [vmem:[%s3683_s4 + $0x94] ss:$8 sps:$4 sm:$0xff]  }
  0xf6   : > { %907 = vmatprep.subr.bf16.mxu0 %v2901_v22  ;;  %1452 = vperm.xlu0 %2872, %v1098_v51   ;;  %v2951_v22 = vld [vmem:[%s3683_s4 + $0x90] ss:$8 sps:$4 sm:$0xff]  }
  0xf7   : > { %1457 = vperm.xlu1 %2873, %v1099_v53  }
  0xf9   : > { %908 = vmatpush1.bf16.msra.mxu0 %v2903_v26  ;;  %v2957_v26 = vld [vmem:[%s3683_s4 + $0xb0] ss:$8 sps:$4 sm:$0xff]  }
  0xfa   : > { %909 = vmatprep.subr.bf16.mxu0 %v2904_v27  ;;  %1462 = vperm.xlu0 %2872, %v1100_v55   ;;  %v2958_v27 = vld [vmem:[%s3683_s4 + $0xc4] ss:$8 sps:$4 sm:$0xff]  }
  0xfb   : > { %1467 = vperm.xlu1 %2873, %v1101_v56  }
  0xfd   : > { %910 = vmatpush1.bf16.msra.mxu0 %v2906_v30  ;;  %v2973_v30 = vld [vmem:[%s3690_s9 + $0x14] ss:$8 sps:$4 sm:$0xff]  }
  0xfe   : > { %911 = vmatprep.subr.bf16.mxu0 %v2907_v31  ;;  %1472 = vperm.xlu0 %2872, %v1102_v57   ;;  %v2975_v31 = vld [vmem:[%s3690_s9 + $0x10] ss:$8 sps:$4 sm:$0xff]  }
  0xff   : > { %1477 = vperm.xlu1 %2873, %v1103_v59   ;;  %1740 = vmatprep.subr.bf16.mxu1 %v2973_v30 }
 0x100   : > { %1741 = vmatpush1.bf16.msra.mxu1 %v2975_v31 }
 0x101   : > { %912 = vmatpush1.bf16.msra.mxu0 %v2909_v34  ;;  %v2976_v34 = vld [vmem:[%s3690_s9 + $0x24] ss:$8 sps:$4 sm:$0xff]  }
 0x102   : > { %913 = vmatprep.subr.bf16.mxu0 %v2910_v35  ;;  %1482 = vperm.xlu0 %2872, %v1104_v61   ;;  %v2978_v35 = vld [vmem:[%s3690_s9 + $0x20] ss:$8 sps:$4 sm:$0xff]  }
 0x103   : > { %1487 = vperm.xlu1 %2873, %v1105_v62   ;;  %1742 = vmatprep.subr.bf16.mxu1 %v2976_v34 }
 0x104   : > { %1743 = vmatpush1.bf16.msra.mxu1 %v2978_v35 }
 0x105   : > { %914 = vmatpush1.bf16.msra.mxu0 %v2912_v38  ;;  %v2963_v38 = vld [vmem:[%s3683_s4 + $0xd0] ss:$8 sps:$4 sm:$0xff]   ;;  %1744 = vmatprep.subr.bf16.mxu1 %v2979_v36 }
 0x106   : > { %915 = vmatprep.subr.bf16.mxu0 %v2913_v39  ;;  %1492 = vperm.xlu0 %2872, %v1106_v63   ;;  %v2964_v39 = vld [vmem:[%s3683_s4 + $0xe4] ss:$8 sps:$4 sm:$0xff]  }
 0x107   : > { %1497 = vperm.xlu1 %2873, %v1107_v1  }
 0x108   : > { %1745 = vmatpush1.bf16.msra.mxu1 %v2981_v37 }
 0x109   : > { %916 = vmatpush1.bf16.msra.mxu0 %v2915_v42  ;;  %1746 = vmatprep.subr.bf16.mxu1 %v2982_v40  ;;  %v2985_v42 = vld [vmem:[%s3690_s9 + $0x54] ss:$8 sps:$4 sm:$0xff]  }
 0x10a   : > { %917 = vmatprep.subr.bf16.mxu0 %v2916_v43  ;;  %1502 = vperm.xlu0 %2872, %v1108_v4   ;;  %v2987_v43 = vld [vmem:[%s3690_s9 + $0x50] ss:$8 sps:$4 sm:$0xff]  }
 0x10b   : > { %1507 = vperm.xlu1 %2873, %v1109_v5  }
 0x10c   : > { %1747 = vmatpush1.bf16.msra.mxu1 %v2984_v41 }
 0x10d   : > { %918 = vmatpush1.bf16.msra.mxu0 %v2918_v45  ;;  %1748 = vmatprep.subr.bf16.mxu1 %v2985_v42  ;;  %v2967_v45 = vld [vmem:[%s3683_s4 + $0xf4] ss:$8 sps:$4 sm:$0xff]  }
 0x10e   : > { %919 = vmatprep.subr.bf16.mxu0 %v2919_v47  ;;  %1512 = vperm.xlu0 %2872, %v1110_v6   ;;  %v2990_v47 = vld [vmem:[%s3690_s9 + $0x60] ss:$8 sps:$4 sm:$0xff]  }
 0x10f   : > { %1517 = vperm.xlu1 %2873, %v1111_v8  }
 0x110   : > { %1749 = vmatpush1.bf16.msra.mxu1 %v2987_v43 }
 0x111   : > { %920 = vmatpush1.bf16.msra.mxu0 %v2921_v50  ;;  %1750 = vmatprep.subr.bf16.mxu1 %v2988_v46  ;;  %v2969_v50 = vld [vmem:[%s3683_s4 + $0xf0] ss:$8 sps:$4 sm:$0xff]  }
 0x112   : > { %1522 = vperm.xlu0 %2872, %v1112_v10  }
 0x113   : > { %1527 = vperm.xlu1 %2873, %v1113_v11  }
 0x114   : > { %922 = vmatmul.mubr.bf16.vlgmr.msra.gmra.mrb[0].mxu0 %v2922_v52  ;;  %1751 = vmatpush1.bf16.msra.mxu1 %v2990_v47 }
 0x115   : > { %931 = vmatprep.mubr.bf16.mxu0 %v2925_v54  ;;  %1752 = vmatprep.subr.bf16.mxu1 %v2991_v48 }
 0x118   : > { %1753 = vmatpush1.bf16.msra.mxu1 %v2993_v49 }
 0x11c   : > { %932 = vmatmul.mubr.bf16.gmra.mrb[4].mxu0 %v2927_v58 }
 0x11d   : > { %941 = vmatprep.mubr.bf16.mxu0 %v2928_v60 }
 0x124   : > { %942 = vmatmul.mubr.bf16.gmra.mrb[8].mxu0 %v2930_v0 }
 0x125   : > { %951 = vmatprep.mubr.bf16.mxu0 %v2931_v2 }
 0x12c   : > { %952 = vmatmul.mubr.bf16.gmra.mrb[12].mxu0 %v2933_v7 }
 0x12d   : > { %961 = vmatprep.mubr.bf16.mxu0 %v2934_v9 }
 0x134   : > { %962 = vmatmul.mubr.bf16.gmra.mrb[16].mxu0 %v2936_v12 }
 0x135   : > { %971 = vmatprep.mubr.bf16.mxu0 %v2937_v13 }
 0x13c   : > { %972 = vmatmul.mubr.bf16.gmra.mrb[20].mxu0 %v2939_v14 }
 0x13d   : > { %981 = vmatprep.mubr.bf16.mxu0 %v2940_v15 }
 0x144   : > { %982 = vmatmul.mubr.bf16.gmra.mrb[24].mxu0 %v2942_v16 }
 0x145   : > { %991 = vmatprep.mubr.bf16.mxu0 %v2943_v17 }
 0x14c   : > { %992 = vmatmul.mubr.bf16.gmra.mrb[28].mxu0 %v2945_v18 }
 0x14d   : > { %1001 = vmatprep.mubr.bf16.mxu0 %v2946_v19 }
 0x154   : > { %1002 = vmatmul.mubr.bf16.gmra.mrb[32].mxu0 %v2948_v20  ;;  %v1373_v18 = vpop.permute.xlu0 %1372 }
 0x155   : > { %1011 = vmatprep.mubr.bf16.mxu0 %v2949_v21 }
 0x159   : > { %v1378_v30 = vpop.permute.xlu0 %1377 }
 0x15c   : > { %1012 = vmatmul.mubr.bf16.gmra.mrb[36].mxu0 %v2951_v22 }
 0x15d   : > { %1021 = vmatprep.mubr.bf16.mxu0 %v2952_v23 }
 0x164   : > { %1022 = vmatmul.mubr.bf16.gmra.mrb[40].mxu0 %v2954_v24 }
 0x165   : > { %1031 = vmatprep.mubr.bf16.mxu0 %v2955_v25 }
 0x16c   : > { %1032 = vmatmul.mubr.bf16.gmra.mrb[44].mxu0 %v2957_v26 }
 0x16d   : > { %1041 = vmatprep.mubr.bf16.mxu0 %v2958_v27 }
 0x174   : > { %1042 = vmatmul.mubr.bf16.gmra.mrb[48].mxu0 %v2960_v32 }
 0x175   : > { %1051 = vmatprep.mubr.bf16.mxu0 %v2961_v33 }
 0x17c   : > { %1052 = vmatmul.mubr.bf16.gmra.mrb[52].mxu0 %v2963_v38  ;;  %v1383_v38 = vpop.permute.xlu1 %1382 }
 0x17d   : > { %1061 = vmatprep.mubr.bf16.mxu0 %v2964_v39 }
 0x184   : > { %1062 = vmatmul.mubr.bf16.gmra.mrb[56].mxu0 %v2966_v44 }
 0x185   : > { %1071 = vmatprep.mubr.bf16.mxu0 %v2967_v45 }
 0x18c   : > { %1072 = vmatmul.mubr.bf16.gmra.mrb[60].mxu0 %v2969_v50 }
 0x1e7   : > { %v923_v51 = vpop.f32.mrb[0].mxu0 }
 0x1e8   : > { %v2612_v52 = vmul.f32 -1.442695, %v923_v51  ;;  %v925_v53 = vpop.f32.mrb[1].mxu0 }
 0x1e9   : > { %v927_v54 = vpop.f32.mrb[2].mxu0 }
 0x1ea   : > { %2994 = vpow2.f32 %v2612_v52  ;;  %v2613_v55 = vmul.f32 -1.442695, %v927_v54  ;;  %v929_v56 = vpop.f32.mrb[3].mxu0 }
 0x1ec   : > { %2996 = vpow2.f32 %v2613_v55 }
 0x1ef   : > { %v933_v57 = vpop.f32.mrb[4].mxu0 }
 0x1f0   : > { %v2614_v58 = vmul.f32 -1.442695, %v933_v57  ;;  %v3899_v59 = vpop.f32.mrb[5].mxu0 }
 0x1f1   : > { %v3901_v60 = vpop.f32.mrb[6].mxu0 }
 0x1f2   : > { %2998 = vpow2.f32 %v2614_v58  ;;  %v2615_v61 = vmul.f32 -1.442695, %v3901_v60  ;;  %v3904_v62 = vpop.f32.mrb[7].mxu0 }
 0x1f4   : > { %v2995_v63 = vpop.eup %2994  ;;  %3000 = vpow2.f32 %v2615_v61 }
 0x1f5   : > { %v1210_v0 = vadd.f32 1.0, %v2995_v63 }
 0x1f6   : > { %v2997_v1 = vpop.eup %2996 }
 0x1f7   : > { %3002 = vrcp.f32 %v1210_v0  ;;  %v1211_v2 = vadd.f32 1.0, %v2997_v1  ;;  %v3906_v4 = vpop.f32.mrb[8].mxu0 }
 0x1f8   : > { %v2616_v5 = vmul.f32 -1.442695, %v3906_v4  ;;  %v3909_v6 = vpop.f32.mrb[9].mxu0 }
 0x1f9   : > { %3004 = vrcp.f32 %v1211_v2  ;;  %v3911_v7 = vpop.f32.mrb[10].mxu0 }
 0x1fa   : > { %3006 = vpow2.f32 %v2616_v5  ;;  %v2617_v8 = vmul.f32 -1.442695, %v3911_v7  ;;  %v3914_v9 = vpop.f32.mrb[11].mxu0 }
 0x1fc   : > { %v2999_v10 = vpop.eup %2998  ;;  %3008 = vpow2.f32 %v2617_v8 }
 0x1fd   : > { %v1212_v11 = vadd.f32 1.0, %v2999_v10 }
 0x1fe   : > { %v3001_v12 = vpop.eup %3000 }
 0x1ff   : > { %3010 = vrcp.f32 %v1212_v11  ;;  %v1213_v13 = vadd.f32 1.0, %v3001_v12  ;;  %v3916_v14 = vpop.f32.mrb[12].mxu0  ;;  %v1393_v11 = vpop.permute.xlu0 %1392 }
 0x200   : > { %v2618_v15 = vmul.f32 -1.442695, %v3916_v14  ;;  %v3919_v16 = vpop.f32.mrb[13].mxu0 }
 0x201   : > { %v3003_v17 = vpop.eup %3002  ;;  %3012 = vrcp.f32 %v1213_v13  ;;  %v3921_v19 = vpop.f32.mrb[14].mxu0 }
 0x202   : > { %v1306_v20 = vmul.f32 %v3003_v17, %v923_v51  ;;  %3014 = vpow2.f32 %v2618_v15  ;;  %v2619_v21 = vmul.f32 -1.442695, %v3921_v19  ;;  %v3924_v22 = vpop.f32.mrb[15].mxu0  ;;  %v1388_v51 = vpop.permute.xlu1 %1387 }
 0x203   : > { %v3005_v23 = vpop.eup %3004 }
 0x204   : > { %v3007_v24 = vpop.eup %3006  ;;  %v1338_v25 = vmul.f32 %v1306_v20, %v925_v53  ;;  %v1307_v26 = vmul.f32 %v3005_v23, %v927_v54  ;;  %3016 = vpow2.f32 %v2619_v21 }
 0x205   : > { %v1214_v27 = vadd.f32 1.0, %v3007_v24 }
 0x206   : > { %v3009_v28 = vpop.eup %3008  ;;  %v1339_v29 = vmul.f32 %v1307_v26, %v929_v56  ;;  %v1530_v33 = vmul.f32 %v1373_v18, %v1338_v25  ;;  %v1398_v12 = vpop.permute.xlu1 %1397 }
 0x207   : > { %3018 = vrcp.f32 %v1214_v27  ;;  %v1215_v31 = vadd.f32 1.0, %v3009_v28  ;;  %v3926_v32 = vpop.f32.mrb[16].mxu0 }
 0x208   : > { %v1531_v34 = vmul.f32 %v1378_v30, %v1339_v29  ;;  %v2620_v35 = vmul.f32 -1.442695, %v3926_v32  ;;  %v3929_v36 = vpop.f32.mrb[17].mxu0 }
 0x209   : > { %v3011_v37 = vpop.eup %3010  ;;  %3020 = vrcp.f32 %v1215_v31  ;;  %v3931_v39 = vpop.f32.mrb[18].mxu0 }
 0x20a   : > { %v1308_v40 = vmul.f32 %v3011_v37, %v933_v57  ;;  %3022 = vpow2.f32 %v2620_v35  ;;  %v2621_v41 = vmul.f32 -1.442695, %v3931_v39  ;;  %v3934_v42 = vpop.f32.mrb[19].mxu0  ;;  %v1626_v43 = vpack.c.bf16 %v1531_v34, %v1530_v33  ;;  %v1403_v33 = vpop.permute.xlu0 %1402 }
 0x20b   : > { %v3013_v44 = vpop.eup %3012  ;;  %v1408_v34 = vpop.permute.xlu1 %1407 }
 0x20c   : > { %v3015_v45 = vpop.eup %3014  ;;  %v1340_v46 = vmul.f32 %v1308_v40, %v3899_v59  ;;  %v1309_v47 = vmul.f32 %v3013_v44, %v3901_v60  ;;  %3024 = vpow2.f32 %v2621_v41  ;;  %1771 = vmatmul.mubr.bf16.vlgmr.msra.gmra.mrb[0].mxu1 %v1626_v43 }
 0x20d   : > { %v1216_v48 = vadd.f32 1.0, %v3015_v45  ;;  %1780 = vmatprep.mubr.bf16.mxu1 %v3372_v3 }
 0x20e   : > { %v3017_v49 = vpop.eup %3016  ;;  %v1341_v50 = vmul.f32 %v1309_v47, %v3904_v62  ;;  %v1532_v54 = vmul.f32 %v1383_v38, %v1340_v46 }
 0x20f   : > { %3026 = vrcp.f32 %v1216_v48  ;;  %v1217_v52 = vadd.f32 1.0, %v3017_v49  ;;  %v3940_v53 = vpop.f32.mrb[20].mxu0 }
 0x210   : > { %v1533_v55 = vmul.f32 %v1388_v51, %v1341_v50  ;;  %v2622_v56 = vmul.f32 -1.442695, %v3940_v53  ;;  %v3943_v57 = vpop.f32.mrb[21].mxu0 }
 0x211   : > { %v3019_v58 = vpop.eup %3018  ;;  %3028 = vrcp.f32 %v1217_v52  ;;  %v3945_v59 = vpop.f32.mrb[22].mxu0 }
 0x212   : > { %v1310_v60 = vmul.f32 %v3019_v58, %v3906_v4  ;;  %3030 = vpow2.f32 %v2622_v56  ;;  %v2623_v61 = vmul.f32 -1.442695, %v3945_v59  ;;  %v3949_v62 = vpop.f32.mrb[23].mxu0  ;;  %v1627_v63 = vpack.c.bf16 %v1533_v55, %v1532_v54  ;;  %v1413_v54 = vpop.permute.xlu0 %1412 }
 0x213   : > { %v3021_v0 = vpop.eup %3020  ;;  %v1418_v55 = vpop.permute.xlu1 %1417 }
 0x214   : > { %v3023_v1 = vpop.eup %3022  ;;  %v1342_v2 = vmul.f32 %v1310_v60, %v3909_v6  ;;  %v1311_v5 = vmul.f32 %v3021_v0, %v3911_v7  ;;  %3032 = vpow2.f32 %v2623_v61  ;;  %1781 = vmatmul.mubr.bf16.gmra.mrb[4].mxu1 %v1627_v63 }
 0x215   : > { %v1218_v8 = vadd.f32 1.0, %v3023_v1  ;;  %1790 = vmatprep.mubr.bf16.mxu1 %v3372_v3 }
 0x216   : > { %v3025_v10 = vpop.eup %3024  ;;  %v1343_v4 = vmul.f32 %v1311_v5, %v3914_v9  ;;  %v1534_v17 = vmul.f32 %v1393_v11, %v1342_v2 }
 0x217   : > { %3034 = vrcp.f32 %v1218_v8  ;;  %v1219_v13 = vadd.f32 1.0, %v3025_v10  ;;  %v3955_v15 = vpop.f32.mrb[24].mxu0 }
 0x218   : > { %v1535_v18 = vmul.f32 %v1398_v12, %v1343_v4  ;;  %v2624_v6 = vmul.f32 -1.442695, %v3955_v15  ;;  %v3958_v20 = vpop.f32.mrb[25].mxu0 }
 0x219   : > { %v3027_v7 = vpop.eup %3026  ;;  %3036 = vrcp.f32 %v1219_v13  ;;  %v3960_v21 = vpop.f32.mrb[26].mxu0 }
 0x21a   : > { %v1312_v23 = vmul.f32 %v3027_v7, %v3916_v14  ;;  %3038 = vpow2.f32 %v2624_v6  ;;  %v2625_v9 = vmul.f32 -1.442695, %v3960_v21  ;;  %v3964_v24 = vpop.f32.mrb[27].mxu0  ;;  %v1628_v25 = vpack.c.bf16 %v1535_v18, %v1534_v17  ;;  %v1423_v17 = vpop.permute.xlu0 %1422 }
 0x21b   : > { %v3029_v26 = vpop.eup %3028  ;;  %v1428_v18 = vpop.permute.xlu1 %1427 }
 0x21c   : > { %v3031_v27 = vpop.eup %3030  ;;  %v1344_v28 = vmul.f32 %v1312_v23, %v3919_v16  ;;  %v1313_v29 = vmul.f32 %v3029_v26, %v3921_v19  ;;  %3040 = vpow2.f32 %v2625_v9  ;;  %1791 = vmatmul.mubr.bf16.gmra.mrb[8].mxu1 %v1628_v25 }
 0x21d   : > { %v1220_v30 = vadd.f32 1.0, %v3031_v27  ;;  %1800 = vmatprep.mubr.bf16.mxu1 %v3372_v3 }
 0x21e   : > { %v3033_v31 = vpop.eup %3032  ;;  %v1345_v14 = vmul.f32 %v1313_v29, %v3924_v22  ;;  %v1536_v38 = vmul.f32 %v1403_v33, %v1344_v28 }
 0x21f   : > { %3042 = vrcp.f32 %v1220_v30  ;;  %v1221_v35 = vadd.f32 1.0, %v3033_v31  ;;  %v3970_v37 = vpop.f32.mrb[28].mxu0 }
 0x220   : > { %v1537_v40 = vmul.f32 %v1408_v34, %v1345_v14  ;;  %v2626_v16 = vmul.f32 -1.442695, %v3970_v37  ;;  %v3973_v41 = vpop.f32.mrb[29].mxu0 }
 0x221   : > { %v3035_v19 = vpop.eup %3034  ;;  %3044 = vrcp.f32 %v1221_v35  ;;  %v3975_v43 = vpop.f32.mrb[30].mxu0 }
 0x222   : > { %v1314_v44 = vmul.f32 %v3035_v19, %v3926_v32  ;;  %3046 = vpow2.f32 %v2626_v16  ;;  %v2627_v22 = vmul.f32 -1.442695, %v3975_v43  ;;  %v3979_v45 = vpop.f32.mrb[31].mxu0  ;;  %v1629_v46 = vpack.c.bf16 %v1537_v40, %v1536_v38  ;;  %v1433_v38 = vpop.permute.xlu0 %1432 }
 0x223   : > { %v3037_v47 = vpop.eup %3036  ;;  %v1438_v40 = vpop.permute.xlu1 %1437 }
 0x224   : > { %v3039_v48 = vpop.eup %3038  ;;  %v1346_v49 = vmul.f32 %v1314_v44, %v3929_v36  ;;  %v1315_v50 = vmul.f32 %v3037_v47, %v3931_v39  ;;  %3048 = vpow2.f32 %v2627_v22  ;;  %1801 = vmatmul.mubr.bf16.gmra.mrb[12].mxu1 %v1629_v46 }
 0x225   : > { %v1222_v51 = vadd.f32 1.0, %v3039_v48  ;;  %1810 = vmatprep.mubr.bf16.mxu1 %v3372_v3 }
 0x226   : > { %v3041_v52 = vpop.eup %3040  ;;  %v1347_v32 = vmul.f32 %v1315_v50, %v3934_v42  ;;  %v1538_v60 = vmul.f32 %v1413_v54, %v1346_v49 }
 0x227   : > { %3050 = vrcp.f32 %v1222_v51  ;;  %v1223_v56 = vadd.f32 1.0, %v3041_v52  ;;  %v3985_v58 = vpop.f32.mrb[32].mxu0 }
 0x228   : > { %v1539_v61 = vmul.f32 %v1418_v55, %v1347_v32  ;;  %v2628_v36 = vmul.f32 -1.442695, %v3985_v58  ;;  %v3988_v63 = vpop.f32.mrb[33].mxu0 }
 0x229   : > { %v3043_v39 = vpop.eup %3042  ;;  %3052 = vrcp.f32 %v1223_v56  ;;  %v3990_v0 = vpop.f32.mrb[34].mxu0 }
 0x22a   : > { %v1316_v1 = vmul.f32 %v3043_v39, %v3940_v53  ;;  %3054 = vpow2.f32 %v2628_v36  ;;  %v2629_v42 = vmul.f32 -1.442695, %v3990_v0  ;;  %v3994_v2 = vpop.f32.mrb[35].mxu0  ;;  %v1630_v5 = vpack.c.bf16 %v1539_v61, %v1538_v60  ;;  %v1443_v60 = vpop.permute.xlu0 %1442 }
 0x22b   : > { %v3045_v8 = vpop.eup %3044  ;;  %v1448_v61 = vpop.permute.xlu1 %1447 }
 0x22c   : > { %v3047_v10 = vpop.eup %3046  ;;  %v1348_v11 = vmul.f32 %v1316_v1, %v3943_v57  ;;  %v1317_v4 = vmul.f32 %v3045_v8, %v3945_v59  ;;  %3056 = vpow2.f32 %v2629_v42  ;;  %1811 = vmatmul.mubr.bf16.gmra.mrb[16].mxu1 %v1630_v5 }
 0x22d   : > { %v1224_v12 = vadd.f32 1.0, %v3047_v10  ;;  %1820 = vmatprep.mubr.bf16.mxu1 %v3372_v3 }
 0x22e   : > { %v3049_v13 = vpop.eup %3048  ;;  %v1349_v53 = vmul.f32 %v1317_v4, %v3949_v62  ;;  %v1540_v23 = vmul.f32 %v1423_v17, %v1348_v11 }
 0x22f   : > { %3058 = vrcp.f32 %v1224_v12  ;;  %v1225_v6 = vadd.f32 1.0, %v3049_v13  ;;  %v4000_v7 = vpop.f32.mrb[36].mxu0 }
 0x230   : > { %v1541_v9 = vmul.f32 %v1428_v18, %v1349_v53  ;;  %v2630_v57 = vmul.f32 -1.442695, %v4000_v7  ;;  %v4003_v25 = vpop.f32.mrb[37].mxu0 }
 0x231   : > { %v3051_v59 = vpop.eup %3050  ;;  %3060 = vrcp.f32 %v1225_v6  ;;  %v4005_v26 = vpop.f32.mrb[38].mxu0 }
 0x232   : > { %v1318_v27 = vmul.f32 %v3051_v59, %v3955_v15  ;;  %3062 = vpow2.f32 %v2630_v57  ;;  %v2631_v62 = vmul.f32 -1.442695, %v4005_v26  ;;  %v4009_v28 = vpop.f32.mrb[39].mxu0  ;;  %v1631_v29 = vpack.c.bf16 %v1541_v9, %v1540_v23  ;;  %v1453_v23 = vpop.permute.xlu0 %1452 }
 0x233   : > { %v3053_v30 = vpop.eup %3052  ;;  %v1458_v9 = vpop.permute.xlu1 %1457 }
 0x234   : > { %v3055_v31 = vpop.eup %3054  ;;  %v1350_v33 = vmul.f32 %v1318_v27, %v3958_v20  ;;  %v1319_v14 = vmul.f32 %v3053_v30, %v3960_v21  ;;  %3064 = vpow2.f32 %v2631_v62  ;;  %1821 = vmatmul.mubr.bf16.gmra.mrb[20].mxu1 %v1631_v29 }
 0x235   : > { %v1226_v34 = vadd.f32 1.0, %v3055_v31  ;;  %1830 = vmatprep.mubr.bf16.mxu1 %v3372_v3 }
 0x236   : > { %v3057_v35 = vpop.eup %3056  ;;  %v1351_v15 = vmul.f32 %v1319_v14, %v3964_v24  ;;  %v1542_v44 = vmul.f32 %v1433_v38, %v1350_v33 }
 0x237   : > { %3066 = vrcp.f32 %v1226_v34  ;;  %v1227_v16 = vadd.f32 1.0, %v3057_v35  ;;  %v4015_v19 = vpop.f32.mrb[40].mxu0 }
 0x238   : > { %v1543_v22 = vmul.f32 %v1438_v40, %v1351_v15  ;;  %v2632_v20 = vmul.f32 -1.442695, %v4015_v19  ;;  %v4018_v46 = vpop.f32.mrb[41].mxu0 }
 0x239   : > { %v3059_v21 = vpop.eup %3058  ;;  %3068 = vrcp.f32 %v1227_v16  ;;  %v4020_v47 = vpop.f32.mrb[42].mxu0 }
 0x23a   : > { %v1320_v48 = vmul.f32 %v3059_v21, %v3970_v37  ;;  %3070 = vpow2.f32 %v2632_v20  ;;  %v2633_v24 = vmul.f32 -1.442695, %v4020_v47  ;;  %v4024_v49 = vpop.f32.mrb[43].mxu0  ;;  %v1632_v50 = vpack.c.bf16 %v1543_v22, %v1542_v44  ;;  %v1463_v44 = vpop.permute.xlu0 %1462 }
 0x23b   : > { %v3061_v51 = vpop.eup %3060  ;;  %v1468_v22 = vpop.permute.xlu1 %1467 }
 0x23c   : > { %v3063_v52 = vpop.eup %3062  ;;  %v1352_v54 = vmul.f32 %v1320_v48, %v3973_v41  ;;  %v1321_v32 = vmul.f32 %v3061_v51, %v3975_v43  ;;  %3072 = vpow2.f32 %v2633_v24  ;;  %1831 = vmatmul.mubr.bf16.gmra.mrb[24].mxu1 %v1632_v50 }
 0x23d   : > { %v1228_v55 = vadd.f32 1.0, %v3063_v52  ;;  %1840 = vmatprep.mubr.bf16.mxu1 %v3372_v3 }
 0x23e   : > { %v3065_v56 = vpop.eup %3064  ;;  %v1353_v37 = vmul.f32 %v1321_v32, %v3979_v45  ;;  %v1544_v1 = vmul.f32 %v1443_v60, %v1352_v54 }
 0x23f   : > { %3074 = vrcp.f32 %v1228_v55  ;;  %v1229_v36 = vadd.f32 1.0, %v3065_v56  ;;  %v4030_v39 = vpop.f32.mrb[44].mxu0 }
 0x240   : > { %v1545_v42 = vmul.f32 %v1448_v61, %v1353_v37  ;;  %v2634_v41 = vmul.f32 -1.442695, %v4030_v39  ;;  %v4033_v5 = vpop.f32.mrb[45].mxu0 }
 0x241   : > { %v3067_v43 = vpop.eup %3066  ;;  %3076 = vrcp.f32 %v1229_v36  ;;  %v4035_v8 = vpop.f32.mrb[46].mxu0 }
 0x242   : > { %v1322_v10 = vmul.f32 %v3067_v43, %v3985_v58  ;;  %3078 = vpow2.f32 %v2634_v41  ;;  %v2635_v45 = vmul.f32 -1.442695, %v4035_v8  ;;  %v4039_v11 = vpop.f32.mrb[47].mxu0  ;;  %v1633_v4 = vpack.c.bf16 %v1545_v42, %v1544_v1  ;;  %v1473_v1 = vpop.permute.xlu0 %1472 }
 0x243   : > { %v3069_v12 = vpop.eup %3068  ;;  %v1478_v42 = vpop.permute.xlu1 %1477 }
 0x244   : > { %v3071_v13 = vpop.eup %3070  ;;  %v1354_v17 = vmul.f32 %v1322_v10, %v3988_v63  ;;  %v1323_v53 = vmul.f32 %v3069_v12, %v3990_v0  ;;  %3080 = vpow2.f32 %v2635_v45  ;;  %1841 = vmatmul.mubr.bf16.gmra.mrb[28].mxu1 %v1633_v4 }
 0x245   : > { %v1230_v18 = vadd.f32 1.0, %v3071_v13  ;;  %1850 = vmatprep.mubr.bf16.mxu1 %v3372_v3 }
 0x246   : > { %v3073_v6 = vpop.eup %3072  ;;  %v1355_v58 = vmul.f32 %v1323_v53, %v3994_v2  ;;  %v1546_v27 = vmul.f32 %v1453_v23, %v1354_v17 }
 0x247   : > { %3082 = vrcp.f32 %v1230_v18  ;;  %v1231_v57 = vadd.f32 1.0, %v3073_v6  ;;  %v4045_v59 = vpop.f32.mrb[48].mxu0 }
 0x248   : > { %v1547_v62 = vmul.f32 %v1458_v9, %v1355_v58  ;;  %v2636_v63 = vmul.f32 -1.442695, %v4045_v59  ;;  %v4048_v29 = vpop.f32.mrb[49].mxu0 }
 0x249   : > { %v3075_v0 = vpop.eup %3074  ;;  %3084 = vrcp.f32 %v1231_v57  ;;  %v4050_v30 = vpop.f32.mrb[50].mxu0 }
 0x24a   : > { %v1324_v31 = vmul.f32 %v3075_v0, %v4000_v7  ;;  %3086 = vpow2.f32 %v2636_v63  ;;  %v2637_v2 = vmul.f32 -1.442695, %v4050_v30  ;;  %v4054_v33 = vpop.f32.mrb[51].mxu0  ;;  %v1634_v14 = vpack.c.bf16 %v1547_v62, %v1546_v27  ;;  %v1483_v27 = vpop.permute.xlu0 %1482 }
 0x24b   : > { %v3077_v34 = vpop.eup %3076  ;;  %v1488_v62 = vpop.permute.xlu1 %1487 }
 0x24c   : > { %v3079_v35 = vpop.eup %3078  ;;  %v1356_v38 = vmul.f32 %v1324_v31, %v4003_v25  ;;  %v1325_v15 = vmul.f32 %v3077_v34, %v4005_v26  ;;  %3088 = vpow2.f32 %v2637_v2  ;;  %1851 = vmatmul.mubr.bf16.gmra.mrb[32].mxu1 %v1634_v14 }
 0x24d   : > { %v1232_v40 = vadd.f32 1.0, %v3079_v35  ;;  %1860 = vmatprep.mubr.bf16.mxu1 %v3372_v3 }
 0x24e   : > { %v3081_v16 = vpop.eup %3080  ;;  %v1357_v7 = vmul.f32 %v1325_v15, %v4009_v28  ;;  %v1548_v48 = vmul.f32 %v1463_v44, %v1356_v38 }
 0x24f   : > { %3090 = vrcp.f32 %v1232_v40  ;;  %v1233_v20 = vadd.f32 1.0, %v3081_v16  ;;  %v4060_v21 = vpop.f32.mrb[52].mxu0 }
 0x250   : > { %v1549_v24 = vmul.f32 %v1468_v22, %v1357_v7  ;;  %v2638_v25 = vmul.f32 -1.442695, %v4060_v21  ;;  %v4063_v50 = vpop.f32.mrb[53].mxu0 }
 0x251   : > { %v3083_v26 = vpop.eup %3082  ;;  %3092 = vrcp.f32 %v1233_v20  ;;  %v4065_v51 = vpop.f32.mrb[54].mxu0 }
 0x252   : > { %v1326_v52 = vmul.f32 %v3083_v26, %v4015_v19  ;;  %3094 = vpow2.f32 %v2638_v25  ;;  %v2639_v28 = vmul.f32 -1.442695, %v4065_v51  ;;  %v4069_v54 = vpop.f32.mrb[55].mxu0  ;;  %v1635_v32 = vpack.c.bf16 %v1549_v24, %v1548_v48  ;;  %v1493_v24 = vpop.permute.xlu0 %1492 }
 0x253   : > { %v3085_v55 = vpop.eup %3084 }
 0x254   : > { %v3087_v56 = vpop.eup %3086  ;;  %v1358_v60 = vmul.f32 %v1326_v52, %v4018_v46  ;;  %v1327_v37 = vmul.f32 %v3085_v55, %v4020_v47  ;;  %3096 = vpow2.f32 %v2639_v28  ;;  %1861 = vmatmul.mubr.bf16.gmra.mrb[36].mxu1 %v1635_v32 }
 0x255   : > { %v1234_v61 = vadd.f32 1.0, %v3087_v56  ;;  %1870 = vmatprep.mubr.bf16.mxu1 %v3372_v3 }
 0x256   : > { %v3089_v36 = vpop.eup %3088  ;;  %v1359_v19 = vmul.f32 %v1327_v37, %v4024_v49  ;;  %v1550_v10 = vmul.f32 %v1473_v1, %v1358_v60 }
 0x257   : > { %3098 = vrcp.f32 %v1234_v61  ;;  %v1235_v41 = vadd.f32 1.0, %v3089_v36  ;;  %v4075_v43 = vpop.f32.mrb[56].mxu0  ;;  %v1503_v36 = vpop.permute.xlu0 %1502 }
 0x258   : > { %v1551_v45 = vmul.f32 %v1478_v42, %v1359_v19  ;;  %v2640_v46 = vmul.f32 -1.442695, %v4075_v43  ;;  %v4078_v4 = vpop.f32.mrb[57].mxu0 }
 0x259   : > { %v3091_v47 = vpop.eup %3090  ;;  %3100 = vrcp.f32 %v1235_v41  ;;  %v4080_v12 = vpop.f32.mrb[58].mxu0 }
 0x25a   : > { %v1328_v13 = vmul.f32 %v3091_v47, %v4030_v39  ;;  %3102 = vpow2.f32 %v2640_v46  ;;  %v2641_v49 = vmul.f32 -1.442695, %v4080_v12  ;;  %v4084_v17 = vpop.f32.mrb[59].mxu0  ;;  %v1636_v53 = vpack.c.bf16 %v1551_v45, %v1550_v10 }
 0x25b   : > { %v3093_v18 = vpop.eup %3092  ;;  %v1513_v47 = vpop.permute.xlu0 %1512 }
 0x25c   : > { %v3095_v6 = vpop.eup %3094  ;;  %v1360_v23 = vmul.f32 %v1328_v13, %v4033_v5  ;;  %v1329_v58 = vmul.f32 %v3093_v18, %v4035_v8  ;;  %3104 = vpow2.f32 %v2641_v49  ;;  %1871 = vmatmul.mubr.bf16.gmra.mrb[40].mxu1 %v1636_v53 }
 0x25d   : > { %v1236_v9 = vadd.f32 1.0, %v3095_v6  ;;  %1880 = vmatprep.mubr.bf16.mxu1 %v3372_v3 }
 0x25e   : > { %v3097_v57 = vpop.eup %3096  ;;  %v1361_v39 = vmul.f32 %v1329_v58, %v4039_v11  ;;  %v1552_v31 = vmul.f32 %v1483_v27, %v1360_v23 }
 0x25f   : > { %3106 = vrcp.f32 %v1236_v9  ;;  %v1237_v63 = vadd.f32 1.0, %v3097_v57  ;;  %v4090_v0 = vpop.f32.mrb[60].mxu0 }
 0x260   : > { %v1553_v2 = vmul.f32 %v1488_v62, %v1361_v39  ;;  %v2642_v5 = vmul.f32 -1.442695, %v4090_v0  ;;  %v1075_v14 = vpop.f32.mrb[61].mxu0  ;;  %v1562_v62 = vld [vmem:[#allocation2] sm:$0xff] }
 0x261   : > { %v3099_v8 = vpop.eup %3098  ;;  %3108 = vrcp.f32 %v1237_v63  ;;  %v1077_v34 = vpop.f32.mrb[62].mxu0  ;;  %v1563_v63 = vld [vmem:[#allocation2 + $0x8] sm:$0xff] }
 0x262   : > { %v1330_v35 = vmul.f32 %v3099_v8, %v4045_v59  ;;  %3110 = vpow2.f32 %v2642_v5  ;;  %v2643_v38 = vmul.f32 -1.442695, %v1077_v34  ;;  %v1079_v15 = vpop.f32.mrb[63].mxu0  ;;  %v1637_v40 = vpack.c.bf16 %v1553_v2, %v1552_v31  ;;  %v1498_v59 = vpop.permute.xlu1 %1497  ;;  %v1564_v2 = vld [vmem:[#allocation2 + $0x10] sm:$0xff]  ;;  %v1565_v8 = vld [vmem:[#allocation2 + $0x18] sm:$0xff] }
 0x263   : > { %v3101_v11 = vpop.eup %3100 }
 0x264   : > { %v3103_v16 = vpop.eup %3102  ;;  %v1362_v44 = vmul.f32 %v1330_v35, %v4048_v29  ;;  %v1331_v7 = vmul.f32 %v3101_v11, %v4050_v30  ;;  %3112 = vpow2.f32 %v2643_v38  ;;  %1881 = vmatmul.mubr.bf16.gmra.mrb[44].mxu1 %v1637_v40  ;;  %v1567_v40 = vld [vmem:[#allocation2 + $0x28] sm:$0xff] }
 0x265   : > { %v1238_v22 = vadd.f32 1.0, %v3103_v16  ;;  %1890 = vmatprep.mubr.bf16.mxu1 %v3372_v3  ;;  %v1568_v16 = vld [vmem:[#allocation2 + $0x30] sm:$0xff] }
 0x266   : > { %v3105_v20 = vpop.eup %3104  ;;  %v1363_v48 = vmul.f32 %v1331_v7, %v4054_v33  ;;  %v1554_v26 = vmul.f32 %v1493_v24, %v1362_v44  ;;  %v1508_v1 = vpop.permute.xlu1 %1507 }
 0x267   : > { %3114 = vrcp.f32 %v1238_v22  ;;  %v1239_v25 = vadd.f32 1.0, %v3105_v20  ;;  %v1569_v22 = vld [vmem:[#allocation2 + $0x38] sm:$0xff] }
 0x268   : > { %v1555_v52 = vmul.f32 %v1498_v59, %v1363_v48 }
 0x269   : > { %v3107_v28 = vpop.eup %3106  ;;  %3116 = vrcp.f32 %v1239_v25 }
 0x26a   : > { %v1332_v29 = vmul.f32 %v3107_v28, %v4060_v21  ;;  %v1638_v32 = vpack.c.bf16 %v1555_v52, %v1554_v26  ;;  %v1518_v13 = vpop.permute.xlu1 %1517  ;;  %v1570_v26 = vld [vmem:[#allocation2 + $0x40] sm:$0xff]  ;;  %v1571_v52 = vld [vmem:[#allocation2 + $0x48] sm:$0xff] }
 0x26b   : > { %v3109_v30 = vpop.eup %3108 }
 0x26c   : > { %v3111_v55 = vpop.eup %3110  ;;  %v1364_v56 = vmul.f32 %v1332_v29, %v4063_v50  ;;  %v1333_v60 = vmul.f32 %v3109_v30, %v4065_v51  ;;  %1891 = vmatmul.mubr.bf16.gmra.mrb[48].mxu1 %v1638_v32  ;;  %v1572_v29 = vld [vmem:[#allocation2 + $0x50] sm:$0xff] }
 0x26d   : > { %v1240_v37 = vadd.f32 1.0, %v3111_v55  ;;  %1900 = vmatprep.mubr.bf16.mxu1 %v3372_v3  ;;  %v1573_v55 = vld [vmem:[#allocation2 + $0x58] sm:$0xff] }
 0x26e   : > { %v3113_v33 = vpop.eup %3112  ;;  %v1365_v61 = vmul.f32 %v1333_v60, %v4069_v54  ;;  %v1556_v42 = vmul.f32 %v1503_v36, %v1364_v56  ;;  %v1528_v57 = vpop.permute.xlu1 %1527  ;;  %v1574_v36 = vld [vmem:[#allocation2 + $0x60] sm:$0xff] }
 0x26f   : > { %3118 = vrcp.f32 %v1240_v37  ;;  %v1241_v19 = vadd.f32 1.0, %v3113_v33 }
 0x270   : > { %v1557_v21 = vmul.f32 %v1508_v1, %v1365_v61  ;;  %v1575_v1 = vld [vmem:[#allocation2 + $0x68] sm:$0xff] }
 0x271   : > { %v3115_v41 = vpop.eup %3114  ;;  %3120 = vrcp.f32 %v1241_v19 }
 0x272   : > { %v1334_v10 = vmul.f32 %v3115_v41, %v4075_v43  ;;  %v1639_v50 = vpack.c.bf16 %v1557_v21, %v1556_v42  ;;  %v1576_v42 = vld [vmem:[#allocation2 + $0x70] sm:$0xff] }
 0x273   : > { %v3117_v45 = vpop.eup %3116 }
 0x274   : > { %v1366_v51 = vmul.f32 %v1334_v10, %v4078_v4  ;;  %v1335_v46 = vmul.f32 %v3117_v45, %v4080_v12  ;;  %1901 = vmatmul.mubr.bf16.gmra.mrb[52].mxu1 %v1639_v50  ;;  %v1523_v12 = vpop.permute.xlu0 %1522  ;;  %v1577_v10 = vld [vmem:[#allocation2 + $0x78] sm:$0xff] }
 0x275   : > { %1910 = vmatprep.mubr.bf16.mxu1 %v3372_v3 }
 0x276   : > { %v1367_v54 = vmul.f32 %v1335_v46, %v4084_v17  ;;  %v1558_v49 = vmul.f32 %v1513_v47, %v1366_v51  ;;  %v1578_v47 = vld [vmem:[#allocation2 + $0x80] sm:$0xff] }
 0x278   : > { %v1559_v53 = vmul.f32 %v1518_v13, %v1367_v54  ;;  %v1579_v13 = vld [vmem:[#allocation2 + $0x88] sm:$0xff] }
 0x279   : > { %v3119_v18 = vpop.eup %3118 }
 0x27a   : > { %v1336_v6 = vmul.f32 %v3119_v18, %v4090_v0  ;;  %v1640_v23 = vpack.c.bf16 %v1559_v53, %v1558_v49  ;;  %v1580_v53 = vld [vmem:[#allocation2 + $0x90] sm:$0xff] }
 0x27b   : > { %v3121_v43 = vpop.eup %3120 }
 0x27c   : > { %v1368_v58 = vmul.f32 %v1336_v6, %v1075_v14  ;;  %v1337_v9 = vmul.f32 %v3121_v43, %v1077_v34  ;;  %1911 = vmatmul.mubr.bf16.gmra.mrb[56].mxu1 %v1640_v23  ;;  %v1581_v23 = vld [vmem:[#allocation2 + $0x98] sm:$0xff] }
 0x27d   : > { %1920 = vmatprep.mubr.bf16.mxu1 %v3372_v3 }
 0x27e   : > { %v1369_v4 = vmul.f32 %v1337_v9, %v1079_v15  ;;  %v1560_v27 = vmul.f32 %v1523_v12, %v1368_v58  ;;  %v1566_v15 = vld [vmem:[#allocation2 + $0x20] sm:$0xff] }
 0x280   : > { %v1561_v39 = vmul.f32 %v1528_v57, %v1369_v4  ;;  %v1582_v57 = vld [vmem:[#allocation2 + $0xa0] sm:$0xff] }
 0x282   : > { %v1641_v17 = vpack.c.bf16 %v1561_v39, %v1560_v27  ;;  %v1583_v27 = vld [vmem:[#allocation2 + $0xa8] sm:$0xff] }
 0x284   : > { %1921 = vmatmul.mubr.bf16.gmra.mrb[60].mxu1 %v1641_v17  ;;  %v1584_v17 = vld [vmem:[#allocation2 + $0xb0] sm:$0xff] }
 0x2df   : > { %v1772_v31 = vpop.f32.mrb[0].mxu1 }
 0x2e0   : > { %v1931_v5 = vadd.f32 %v1772_v31, %v1562_v62  ;;  %v1774_v0 = vpop.f32.mrb[1].mxu1  ;;  %v1585_v31 = vld [vmem:[#allocation2 + $0xb8] sm:$0xff] }
 0x2e1   : > { %v1932_v35 = vadd.f32 %v1774_v0, %v1563_v63  ;;  %v1776_v14 = vpop.f32.mrb[2].mxu1 }
 0x2e2   : > { %1995 = vst [vmem:[#allocation2] sm:$0xff] %v1931_v5  ;;  %v1933_v34 = vadd.f32 %v1776_v14, %v1564_v2  ;;  %v1778_v38 = vpop.f32.mrb[3].mxu1  ;;  %v1586_v14 = vld [vmem:[#allocation2 + $0xc0] sm:$0xff] }
 0x2e3   : > { %1996 = vst [vmem:[#allocation2 + $0x8] sm:$0xff] %v1932_v35  ;;  %v1934_v3 = vadd.f32 %v1778_v38, %v1565_v8 }
 0x2e4   : > { %1997 = vst [vmem:[#allocation2 + $0x10] sm:$0xff] %v1933_v34  ;;  %v1587_v34 = vld [vmem:[#allocation2 + $0xc8] sm:$0xff] }
 0x2e5   : > { %1998 = vst [vmem:[#allocation2 + $0x18] sm:$0xff] %v1934_v3  ;;  %v1588_v3 = vld [vmem:[#allocation2 + $0xd0] sm:$0xff] }
 0x2e7   : > { %v1782_v11 = vpop.f32.mrb[4].mxu1 }
 0x2e8   : > { %v1935_v44 = vadd.f32 %v1782_v11, %v1566_v15  ;;  %v1784_v7 = vpop.f32.mrb[5].mxu1  ;;  %v1589_v11 = vld [vmem:[#allocation2 + $0xd8] sm:$0xff] }
 0x2e9   : > { %v1936_v20 = vadd.f32 %v1784_v7, %v1567_v40  ;;  %v1786_v48 = vpop.f32.mrb[6].mxu1 }
 0x2ea   : > { %1999 = vst [vmem:[#allocation2 + $0x20] sm:$0xff] %v1935_v44  ;;  %v1937_v24 = vadd.f32 %v1786_v48, %v1568_v16  ;;  %v1788_v59 = vpop.f32.mrb[7].mxu1  ;;  %v1590_v48 = vld [vmem:[#allocation2 + $0xe0] sm:$0xff] }
 0x2eb   : > { %2000 = vst [vmem:[#allocation2 + $0x28] sm:$0xff] %v1936_v20  ;;  %v1938_v25 = vadd.f32 %v1788_v59, %v1569_v22 }
 0x2ec   : > { %2001 = vst [vmem:[#allocation2 + $0x30] sm:$0xff] %v1937_v24  ;;  %v1591_v24 = vld [vmem:[#allocation2 + $0xe8] sm:$0xff] }
 0x2ed   : > { %2002 = vst [vmem:[#allocation2 + $0x38] sm:$0xff] %v1938_v25  ;;  %v1592_v25 = vld [vmem:[#allocation2 + $0xf0] sm:$0xff] }
 0x2ef   : > { %v1792_v28 = vpop.f32.mrb[8].mxu1 }
 0x2f0   : > { %v1939_v32 = vadd.f32 %v1792_v28, %v1570_v26  ;;  %v1794_v30 = vpop.f32.mrb[9].mxu1  ;;  %v1593_v28 = vld [vmem:[#allocation2 + $0xf8] sm:$0xff] }
 0x2f1   : > { %v1940_v56 = vadd.f32 %v1794_v30, %v1571_v52  ;;  %v1796_v60 = vpop.f32.mrb[10].mxu1 }
 0x2f2   : > { %2003 = vst [vmem:[#allocation2 + $0x40] sm:$0xff] %v1939_v32  ;;  %v1941_v37 = vadd.f32 %v1796_v60, %v1572_v29  ;;  %v1798_v33 = vpop.f32.mrb[11].mxu1  ;;  %v1594_v60 = vld [vmem:[#allocation2 + $0x100] sm:$0xff] }
 0x2f3   : > { %2004 = vst [vmem:[#allocation2 + $0x48] sm:$0xff] %v1940_v56  ;;  %v1942_v61 = vadd.f32 %v1798_v33, %v1573_v55 }
 0x2f4   : > { %2005 = vst [vmem:[#allocation2 + $0x50] sm:$0xff] %v1941_v37  ;;  %v1595_v37 = vld [vmem:[#allocation2 + $0x108] sm:$0xff] }
 0x2f5   : > { %2006 = vst [vmem:[#allocation2 + $0x58] sm:$0xff] %v1942_v61  ;;  %v1596_v61 = vld [vmem:[#allocation2 + $0x110] sm:$0xff] }
 0x2f7   : > { %v1802_v19 = vpop.f32.mrb[12].mxu1 }
 0x2f8   : > { %v1943_v21 = vadd.f32 %v1802_v19, %v1574_v36  ;;  %v1804_v41 = vpop.f32.mrb[13].mxu1  ;;  %v1597_v19 = vld [vmem:[#allocation2 + $0x118] sm:$0xff] }
 0x2f9   : > { %v1944_v50 = vadd.f32 %v1804_v41, %v1575_v1  ;;  %v1806_v45 = vpop.f32.mrb[14].mxu1 }
 0x2fa   : > { %2007 = vst [vmem:[#allocation2 + $0x60] sm:$0xff] %v1943_v21  ;;  %v1945_v51 = vadd.f32 %v1806_v45, %v1576_v42  ;;  %v1808_v46 = vpop.f32.mrb[15].mxu1  ;;  %v1598_v45 = vld [vmem:[#allocation2 + $0x120] sm:$0xff] }
 0x2fb   : > { %2008 = vst [vmem:[#allocation2 + $0x68] sm:$0xff] %v1944_v50  ;;  %v1946_v54 = vadd.f32 %v1808_v46, %v1577_v10 }
 0x2fc   : > { %2009 = vst [vmem:[#allocation2 + $0x70] sm:$0xff] %v1945_v51  ;;  %v1599_v51 = vld [vmem:[#allocation2 + $0x128] sm:$0xff] }
 0x2fd   : > { %2010 = vst [vmem:[#allocation2 + $0x78] sm:$0xff] %v1946_v54  ;;  %v1600_v54 = vld [vmem:[#allocation2 + $0x130] sm:$0xff] }
 0x2ff   : > { %v1812_v49 = vpop.f32.mrb[16].mxu1 }
 0x300   : > { %v1947_v18 = vadd.f32 %v1812_v49, %v1578_v47  ;;  %v1814_v6 = vpop.f32.mrb[17].mxu1  ;;  %v1601_v49 = vld [vmem:[#allocation2 + $0x138] sm:$0xff] }
 0x301   : > { %v1948_v43 = vadd.f32 %v1814_v6, %v1579_v13  ;;  %v1816_v58 = vpop.f32.mrb[18].mxu1 }
 0x302   : > { %2011 = vst [vmem:[#allocation2 + $0x80] sm:$0xff] %v1947_v18  ;;  %v1949_v9 = vadd.f32 %v1816_v58, %v1580_v53  ;;  %v1818_v4 = vpop.f32.mrb[19].mxu1  ;;  %v1602_v58 = vld [vmem:[#allocation2 + $0x140] sm:$0xff] }
 0x303   : > { %2012 = vst [vmem:[#allocation2 + $0x88] sm:$0xff] %v1948_v43  ;;  %v1950_v12 = vadd.f32 %v1818_v4, %v1581_v23 }
 0x304   : > { %2013 = vst [vmem:[#allocation2 + $0x90] sm:$0xff] %v1949_v9  ;;  %v1603_v9 = vld [vmem:[#allocation2 + $0x148] sm:$0xff] }
 0x305   : > { %2014 = vst [vmem:[#allocation2 + $0x98] sm:$0xff] %v1950_v12  ;;  %v1604_v12 = vld [vmem:[#allocation2 + $0x150] sm:$0xff] }
 0x307   : > { %v1822_v39 = vpop.f32.mrb[20].mxu1 }
 0x308   : > { %v1951_v62 = vadd.f32 %v1822_v39, %v1582_v57  ;;  %v1824_v63 = vpop.f32.mrb[21].mxu1  ;;  %v1605_v39 = vld [vmem:[#allocation2 + $0x158] sm:$0xff] }
 0x309   : > { %v1952_v2 = vadd.f32 %v1824_v63, %v1583_v27  ;;  %v1826_v5 = vpop.f32.mrb[22].mxu1 }
 0x30a   : > { %2015 = vst [vmem:[#allocation2 + $0xa0] sm:$0xff] %v1951_v62  ;;  %v1953_v0 = vadd.f32 %v1826_v5, %v1584_v17  ;;  %v1828_v8 = vpop.f32.mrb[23].mxu1  ;;  %v1606_v5 = vld [vmem:[#allocation2 + $0x160] sm:$0xff] }
 0x30b   : > { %2016 = vst [vmem:[#allocation2 + $0xa8] sm:$0xff] %v1952_v2  ;;  %v1954_v35 = vadd.f32 %v1828_v8, %v1585_v31 }
 0x30c   : > { %2017 = vst [vmem:[#allocation2 + $0xb0] sm:$0xff] %v1953_v0  ;;  %v1607_v0 = vld [vmem:[#allocation2 + $0x168] sm:$0xff] }
 0x30d   : > { %2018 = vst [vmem:[#allocation2 + $0xb8] sm:$0xff] %v1954_v35  ;;  %v1608_v35 = vld [vmem:[#allocation2 + $0x170] sm:$0xff] }
 0x30f   : > { %v1832_v38 = vpop.f32.mrb[24].mxu1 }
 0x310   : > { %v1955_v15 = vadd.f32 %v1832_v38, %v1586_v14  ;;  %v1834_v40 = vpop.f32.mrb[25].mxu1  ;;  %v1609_v38 = vld [vmem:[#allocation2 + $0x178] sm:$0xff] }
 0x311   : > { %v1956_v16 = vadd.f32 %v1834_v40, %v1587_v34  ;;  %v1836_v44 = vpop.f32.mrb[26].mxu1 }
 0x312   : > { %2019 = vst [vmem:[#allocation2 + $0xc0] sm:$0xff] %v1955_v15  ;;  %v1957_v7 = vadd.f32 %v1836_v44, %v1588_v3  ;;  %v1838_v22 = vpop.f32.mrb[27].mxu1  ;;  %v1610_v44 = vld [vmem:[#allocation2 + $0x180] sm:$0xff] }
 0x313   : > { %2020 = vst [vmem:[#allocation2 + $0xc8] sm:$0xff] %v1956_v16  ;;  %v1958_v20 = vadd.f32 %v1838_v22, %v1589_v11 }
 0x314   : > { %2021 = vst [vmem:[#allocation2 + $0xd0] sm:$0xff] %v1957_v7  ;;  %v1611_v7 = vld [vmem:[#allocation2 + $0x188] sm:$0xff] }
 0x315   : > { %2022 = vst [vmem:[#allocation2 + $0xd8] sm:$0xff] %v1958_v20  ;;  %v1612_v20 = vld [vmem:[#allocation2 + $0x190] sm:$0xff] }
 0x317   : > { %v1842_v59 = vpop.f32.mrb[28].mxu1 }
 0x318   : > { %v1959_v26 = vadd.f32 %v1842_v59, %v1590_v48  ;;  %v1844_v52 = vpop.f32.mrb[29].mxu1  ;;  %v1613_v59 = vld [vmem:[#allocation2 + $0x198] sm:$0xff] }
 0x319   : > { %v1960_v29 = vadd.f32 %v1844_v52, %v1591_v24  ;;  %v1846_v32 = vpop.f32.mrb[30].mxu1 }
 0x31a   : > { %2023 = vst [vmem:[#allocation2 + $0xe0] sm:$0xff] %v1959_v26  ;;  %v1961_v30 = vadd.f32 %v1846_v32, %v1592_v25  ;;  %v1848_v55 = vpop.f32.mrb[31].mxu1  ;;  %v1614_v32 = vld [vmem:[#allocation2 + $0x1a0] sm:$0xff] }
 0x31b   : > { %2024 = vst [vmem:[#allocation2 + $0xe8] sm:$0xff] %v1960_v29  ;;  %v1962_v56 = vadd.f32 %v1848_v55, %v1593_v28 }
 0x31c   : > { %2025 = vst [vmem:[#allocation2 + $0xf0] sm:$0xff] %v1961_v30  ;;  %v1615_v30 = vld [vmem:[#allocation2 + $0x1a8] sm:$0xff] }
 0x31d   : > { %2026 = vst [vmem:[#allocation2 + $0xf8] sm:$0xff] %v1962_v56  ;;  %v1616_v56 = vld [vmem:[#allocation2 + $0x1b0] sm:$0xff] }
 0x31f   : > { %v1852_v33 = vpop.f32.mrb[32].mxu1 }
 0x320   : > { %v1963_v36 = vadd.f32 %v1852_v33, %v1594_v60  ;;  %v1854_v1 = vpop.f32.mrb[33].mxu1  ;;  %v1617_v33 = vld [vmem:[#allocation2 + $0x1b8] sm:$0xff] }
 0x321   : > { %v1964_v42 = vadd.f32 %v1854_v1, %v1595_v37  ;;  %v1856_v21 = vpop.f32.mrb[34].mxu1 }
 0x322   : > { %2027 = vst [vmem:[#allocation2 + $0x100] sm:$0xff] %v1963_v36  ;;  %v1965_v41 = vadd.f32 %v1856_v21, %v1596_v61  ;;  %v1858_v10 = vpop.f32.mrb[35].mxu1  ;;  %v1618_v21 = vld [vmem:[#allocation2 + $0x1c0] sm:$0xff] }
 0x323   : > { %2028 = vst [vmem:[#allocation2 + $0x108] sm:$0xff] %v1964_v42  ;;  %v1966_v50 = vadd.f32 %v1858_v10, %v1597_v19 }
 0x324   : > { %2029 = vst [vmem:[#allocation2 + $0x110] sm:$0xff] %v1965_v41  ;;  %v1619_v41 = vld [vmem:[#allocation2 + $0x1c8] sm:$0xff] }
 0x325   : > { %2030 = vst [vmem:[#allocation2 + $0x118] sm:$0xff] %v1966_v50  ;;  %v1620_v50 = vld [vmem:[#allocation2 + $0x1d0] sm:$0xff] }
 0x327   : > { %v1862_v46 = vpop.f32.mrb[36].mxu1 }
 0x328   : > { %v1967_v47 = vadd.f32 %v1862_v46, %v1598_v45  ;;  %v1864_v13 = vpop.f32.mrb[37].mxu1  ;;  %v1621_v46 = vld [vmem:[#allocation2 + $0x1d8] sm:$0xff] }
 0x329   : > { %v1968_v53 = vadd.f32 %v1864_v13, %v1599_v51  ;;  %v1866_v18 = vpop.f32.mrb[38].mxu1 }
 0x32a   : > { %2031 = vst [vmem:[#allocation2 + $0x120] sm:$0xff] %v1967_v47  ;;  %v1969_v6 = vadd.f32 %v1866_v18, %v1600_v54  ;;  %v1868_v23 = vpop.f32.mrb[39].mxu1  ;;  %v1622_v18 = vld [vmem:[#allocation2 + $0x1e0] sm:$0xff] }
 0x32b   : > { %2032 = vst [vmem:[#allocation2 + $0x128] sm:$0xff] %v1968_v53  ;;  %v1970_v43 = vadd.f32 %v1868_v23, %v1601_v49 }
 0x32c   : > { %2033 = vst [vmem:[#allocation2 + $0x130] sm:$0xff] %v1969_v6  ;;  %v1623_v6 = vld [vmem:[#allocation2 + $0x1e8] sm:$0xff] }
 0x32d   : > { %2034 = vst [vmem:[#allocation2 + $0x138] sm:$0xff] %v1970_v43  ;;  %v1624_v43 = vld [vmem:[#allocation2 + $0x1f0] sm:$0xff] }
 0x32f   : > { %v1872_v4 = vpop.f32.mrb[40].mxu1 }
 0x330   : > { %v1971_v57 = vadd.f32 %v1872_v4, %v1602_v58  ;;  %v1874_v27 = vpop.f32.mrb[41].mxu1  ;;  %v1625_v4 = vld [vmem:[#allocation2 + $0x1f8] sm:$0xff] }
 0x331   : > { %v1972_v17 = vadd.f32 %v1874_v27, %v1603_v9  ;;  %v1876_v62 = vpop.f32.mrb[42].mxu1 }
 0x332   : > { %2035 = vst [vmem:[#allocation2 + $0x140] sm:$0xff] %v1971_v57  ;;  %v1973_v63 = vadd.f32 %v1876_v62, %v1604_v12  ;;  %v1878_v31 = vpop.f32.mrb[43].mxu1 }
 0x333   : > { %2036 = vst [vmem:[#allocation2 + $0x148] sm:$0xff] %v1972_v17  ;;  %v1974_v2 = vadd.f32 %v1878_v31, %v1605_v39 }
 0x334   : > { %2037 = vst [vmem:[#allocation2 + $0x150] sm:$0xff] %v1973_v63 }
 0x335   : > { %2038 = vst [vmem:[#allocation2 + $0x158] sm:$0xff] %v1974_v2 }
 0x337   : > { %v1882_v8 = vpop.f32.mrb[44].mxu1 }
 0x338   : > { %v1975_v14 = vadd.f32 %v1882_v8, %v1606_v5  ;;  %v1884_v34 = vpop.f32.mrb[45].mxu1 }
 0x339   : > { %v1976_v3 = vadd.f32 %v1884_v34, %v1607_v0  ;;  %v1886_v15 = vpop.f32.mrb[46].mxu1 }
 0x33a   : > { %2039 = vst [vmem:[#allocation2 + $0x160] sm:$0xff] %v1975_v14  ;;  %v1977_v40 = vadd.f32 %v1886_v15, %v1608_v35  ;;  %v1888_v11 = vpop.f32.mrb[47].mxu1 }
 0x33b   : > { %2040 = vst [vmem:[#allocation2 + $0x168] sm:$0xff] %v1976_v3  ;;  %v1978_v16 = vadd.f32 %v1888_v11, %v1609_v38 }
 0x33c   : > { %2041 = vst [vmem:[#allocation2 + $0x170] sm:$0xff] %v1977_v40 }
 0x33d   : > { %2042 = vst [vmem:[#allocation2 + $0x178] sm:$0xff] %v1978_v16 }
 0x33f   : > { %v1892_v22 = vpop.f32.mrb[48].mxu1 }
 0x340   : > { %v1979_v48 = vadd.f32 %v1892_v22, %v1610_v44  ;;  %v1894_v24 = vpop.f32.mrb[49].mxu1 }
 0x341   : > { %v1980_v25 = vadd.f32 %v1894_v24, %v1611_v7  ;;  %v1896_v26 = vpop.f32.mrb[50].mxu1 }
 0x342   : > { %2043 = vst [vmem:[#allocation2 + $0x180] sm:$0xff] %v1979_v48  ;;  %v1981_v52 = vadd.f32 %v1896_v26, %v1612_v20  ;;  %v1898_v28 = vpop.f32.mrb[51].mxu1 }
 0x343   : > { %2044 = vst [vmem:[#allocation2 + $0x188] sm:$0xff] %v1980_v25  ;;  %v1982_v29 = vadd.f32 %v1898_v28, %v1613_v59 }
 0x344   : > { %2045 = vst [vmem:[#allocation2 + $0x190] sm:$0xff] %v1981_v52 }
 0x345   : > { %2046 = vst [vmem:[#allocation2 + $0x198] sm:$0xff] %v1982_v29 }
 0x347   : > { %v1902_v55 = vpop.f32.mrb[52].mxu1 }
 0x348   : > { %v1983_v60 = vadd.f32 %v1902_v55, %v1614_v32  ;;  %v1904_v37 = vpop.f32.mrb[53].mxu1 }
 0x349   : > { %v1984_v61 = vadd.f32 %v1904_v37, %v1615_v30  ;;  %v1906_v36 = vpop.f32.mrb[54].mxu1 }
 0x34a   : > { %2047 = vst [vmem:[#allocation2 + $0x1a0] sm:$0xff] %v1983_v60  ;;  %v1985_v1 = vadd.f32 %v1906_v36, %v1616_v56  ;;  %v1908_v19 = vpop.f32.mrb[55].mxu1 }
 0x34b   : > { %2048 = vst [vmem:[#allocation2 + $0x1a8] sm:$0xff] %v1984_v61  ;;  %v1986_v42 = vadd.f32 %v1908_v19, %v1617_v33 }
 0x34c   : > { %2049 = vst [vmem:[#allocation2 + $0x1b0] sm:$0xff] %v1985_v1 }
 0x34d   : > { %2050 = vst [vmem:[#allocation2 + $0x1b8] sm:$0xff] %v1986_v42 }
 0x34f   : > { %v1912_v10 = vpop.f32.mrb[56].mxu1 }
 0x350   : > { %v1987_v45 = vadd.f32 %v1912_v10, %v1618_v21  ;;  %v1914_v51 = vpop.f32.mrb[57].mxu1 }
 0x351   : > { %v1988_v54 = vadd.f32 %v1914_v51, %v1619_v41  ;;  %v1916_v47 = vpop.f32.mrb[58].mxu1 }
 0x352   : > { %2051 = vst [vmem:[#allocation2 + $0x1c0] sm:$0xff] %v1987_v45  ;;  %v1989_v13 = vadd.f32 %v1916_v47, %v1620_v50  ;;  %v1918_v49 = vpop.f32.mrb[59].mxu1 }
 0x353   : > { %2052 = vst [vmem:[#allocation2 + $0x1c8] sm:$0xff] %v1988_v54  ;;  %v1990_v53 = vadd.f32 %v1918_v49, %v1621_v46 }
 0x354   : > { %2053 = vst [vmem:[#allocation2 + $0x1d0] sm:$0xff] %v1989_v13 }
 0x355   : > { %2054 = vst [vmem:[#allocation2 + $0x1d8] sm:$0xff] %v1990_v53 }
 0x357   : > { %v1922_v23 = vpop.f32.mrb[60].mxu1 }
 0x358   : > { %v1991_v58 = vadd.f32 %v1922_v23, %v1622_v18  ;;  %v1924_v9 = vpop.f32.mrb[61].mxu1 }
 0x359   : > { %v1992_v12 = vadd.f32 %v1924_v9, %v1623_v6  ;;  %v1926_v57 = vpop.f32.mrb[62].mxu1 }
 0x35a   : > { %2055 = vst [vmem:[#allocation2 + $0x1e0] sm:$0xff] %v1991_v58  ;;  %v1993_v27 = vadd.f32 %v1926_v57, %v1624_v43  ;;  %v1928_v39 = vpop.f32.mrb[63].mxu1 }
 0x35b   : > { %2056 = vst [vmem:[#allocation2 + $0x1e8] sm:$0xff] %v1992_v12  ;;  %v1994_v17 = vadd.f32 %v1928_v39, %v1625_v4 }
 0x35c   : > { %2057 = vst [vmem:[#allocation2 + $0x1f0] sm:$0xff] %v1993_v27 }
 0x35d   : > { %2058 = vst [vmem:[#allocation2 + $0x1f8] sm:$0xff] %v1994_v17 }
 0x35e PF: > { %s4289_s4 = sld [smem:[#allocation20_spill]]  ;;  %p2059_p12 = scmp.eq.s32.totalorder %s3342_s20, 31 }
 0x364   : > { %p2060_p3 = scmp.eq.s32.totalorder %s4289_s4, 1 }
 0x366   : > { %p2061_p1 = pnand %p2060_p3, %p2059_p12 }
 0x367   : > { %v2065_v62 = vld [vmem:[#allocation2] sm:$0xff] (!%p2061_p1)  ;;  %v2066_v63 = vld [vmem:[#allocation2 + $0x8] sm:$0xff] (!%p2061_p1)  ;;  %v2067_v31 = vld [vmem:[#allocation2 + $0x10] sm:$0xff] (!%p2061_p1) }
 0x368   : > { %2064 = sbr.rel (%p2061_p1) target bundleno = 898 (0x382), region = 56  ;;  %v2702_v2 = vpack.c.bf16 (!%p2061_p1), %v2066_v63, %v2065_v62  ;;  %v2068_v5 = vld [vmem:[#allocation2 + $0x18] sm:$0xff] (!%p2061_p1)  ;;  %v2069_v0 = vld [vmem:[#allocation2 + $0x20] sm:$0xff] (!%p2061_p1)  ;;  %v2070_v8 = vld [vmem:[#allocation2 + $0x28] sm:$0xff] (!%p2061_p1) }
 0x369   : > { %v2703_v35 = vpack.c.bf16 (!%p2061_p1), %v2068_v5, %v2067_v31  ;;  %v2704_v14 = vpack.c.bf16 (!%p2061_p1), %v2070_v8, %v2069_v0  ;;  %v2071_v34 = vld [vmem:[#allocation2 + $0x30] sm:$0xff] (!%p2061_p1)  ;;  %v2072_v38 = vld [vmem:[#allocation2 + $0x38] sm:$0xff] (!%p2061_p1)  ;;  %v2073_v3 = vld [vmem:[#allocation2 + $0x40] sm:$0xff] (!%p2061_p1) }
 0x36a   : > { %2321 = vst [vmem:[%s3717_s5] sm:$0xff] (!%p2061_p1), %v2702_v2  ;;  %v2705_v15 = vpack.c.bf16 (!%p2061_p1), %v2072_v38, %v2071_v34  ;;  %v2074_v40 = vld [vmem:[#allocation2 + $0x48] sm:$0xff] (!%p2061_p1)  ;;  %v2075_v11 = vld [vmem:[#allocation2 + $0x50] sm:$0xff] (!%p2061_p1)  ;;  %v2076_v16 = vld [vmem:[#allocation2 + $0x58] sm:$0xff] (!%p2061_p1) }
 0x36b   : > { %2322 = vst [vmem:[%s3717_s5 + $0x8] sm:$0xff] (!%p2061_p1), %v2703_v35  ;;  %2323 = vst [vmem:[%s3717_s5 + $0x10] sm:$0xff] (!%p2061_p1), %v2704_v14  ;;  %v2706_v44 = vpack.c.bf16 (!%p2061_p1), %v2074_v40, %v2073_v3  ;;  %v2707_v7 = vpack.c.bf16 (!%p2061_p1), %v2076_v16, %v2075_v11  ;;  %v2077_v22 = vld [vmem:[#allocation2 + $0x60] sm:$0xff] (!%p2061_p1)  ;;  %v2078_v20 = vld [vmem:[#allocation2 + $0x68] sm:$0xff] (!%p2061_p1) }
 0x36c   : > { %v2079_v48 = vld [vmem:[#allocation2 + $0x70] sm:$0xff] (!%p2061_p1)  ;;  %2324 = vst [vmem:[%s3717_s5 + $0x18] sm:$0xff] (!%p2061_p1), %v2705_v15  ;;  %v2708_v24 = vpack.c.bf16 (!%p2061_p1), %v2078_v20, %v2077_v22  ;;  %v2080_v59 = vld [vmem:[#allocation2 + $0x78] sm:$0xff] (!%p2061_p1)  ;;  %v2081_v25 = vld [vmem:[#allocation2 + $0x80] sm:$0xff] (!%p2061_p1) }
 0x36d   : > { %v2082_v26 = vld [vmem:[#allocation2 + $0x88] sm:$0xff] (!%p2061_p1)  ;;  %2325 = vst [vmem:[%s3717_s5 + $0x20] sm:$0xff] (!%p2061_p1), %v2706_v44  ;;  %2326 = vst [vmem:[%s3717_s5 + $0x28] sm:$0xff] (!%p2061_p1), %v2707_v7  ;;  %v2709_v52 = vpack.c.bf16 (!%p2061_p1), %v2080_v59, %v2079_v48  ;;  %v2083_v29 = vld [vmem:[#allocation2 + $0x90] sm:$0xff] (!%p2061_p1) }
 0x36e   : > { %v2710_v28 = vpack.c.bf16 (!%p2061_p1), %v2082_v26, %v2081_v25  ;;  %v2084_v32 = vld [vmem:[#allocation2 + $0x98] sm:$0xff] (!%p2061_p1)  ;;  %v2085_v30 = vld [vmem:[#allocation2 + $0xa0] sm:$0xff] (!%p2061_p1)  ;;  %2327 = vst [vmem:[%s3717_s5 + $0x30] sm:$0xff] (!%p2061_p1), %v2708_v24  ;;  %v2086_v56 = vld [vmem:[#allocation2 + $0xa8] sm:$0xff] (!%p2061_p1) }
 0x36f   : > { %v2711_v55 = vpack.c.bf16 %v2084_v32, %v2083_v29  ;;  %v2087_v60 = vld [vmem:[#allocation2 + $0xb0] sm:$0xff]  ;;  %v2088_v37 = vld [vmem:[#allocation2 + $0xb8] sm:$0xff]  ;;  %2328 = vst [vmem:[%s3717_s5 + $0x38] sm:$0xff] %v2709_v52  ;;  %v2712_v33 = vpack.c.bf16 %v2086_v56, %v2085_v30  ;;  %v2089_v36 = vld [vmem:[#allocation2 + $0xc0] sm:$0xff] }
 0x370   : > { %2329 = vst [vmem:[%s3717_s5 + $0x40] sm:$0xff] %v2710_v28  ;;  %v2713_v61 = vpack.c.bf16 %v2088_v37, %v2087_v60  ;;  %v2090_v1 = vld [vmem:[#allocation2 + $0xc8] sm:$0xff]  ;;  %v2091_v19 = vld [vmem:[#allocation2 + $0xd0] sm:$0xff]  ;;  %v2092_v21 = vld [vmem:[#allocation2 + $0xd8] sm:$0xff] }
 0x371   : > { %2330 = vst [vmem:[%s3717_s5 + $0x48] sm:$0xff] %v2711_v55  ;;  %v2714_v42 = vpack.c.bf16 %v2090_v1, %v2089_v36  ;;  %v2093_v41 = vld [vmem:[#allocation2 + $0xe0] sm:$0xff]  ;;  %v2094_v10 = vld [vmem:[#allocation2 + $0xe8] sm:$0xff]  ;;  %2331 = vst [vmem:[%s3717_s5 + $0x50] sm:$0xff] %v2712_v33  ;;  %v2715_v50 = vpack.c.bf16 %v2092_v21, %v2091_v19 }
 0x372   : > { %2332 = vst [vmem:[%s3717_s5 + $0x58] sm:$0xff] %v2713_v61  ;;  %v2716_v45 = vpack.c.bf16 %v2094_v10, %v2093_v41  ;;  %v2095_v51 = vld [vmem:[#allocation2 + $0xf0] sm:$0xff]  ;;  %v2096_v46 = vld [vmem:[#allocation2 + $0xf8] sm:$0xff]  ;;  %v2097_v54 = vld [vmem:[#allocation2 + $0x100] sm:$0xff] }
 0x373   : > { %2333 = vst [vmem:[%s3717_s5 + $0x60] sm:$0xff] %v2714_v42  ;;  %v2717_v47 = vpack.c.bf16 %v2096_v46, %v2095_v51  ;;  %v2098_v13 = vld [vmem:[#allocation2 + $0x108] sm:$0xff]  ;;  %v2099_v49 = vld [vmem:[#allocation2 + $0x110] sm:$0xff]  ;;  %v2100_v53 = vld [vmem:[#allocation2 + $0x118] sm:$0xff] }
 0x374   : > { %2334 = vst [vmem:[%s3717_s5 + $0x68] sm:$0xff] %v2715_v50  ;;  %2335 = vst [vmem:[%s3717_s5 + $0x70] sm:$0xff] %v2716_v45  ;;  %v2718_v18 = vpack.c.bf16 %v2098_v13, %v2097_v54  ;;  %v2719_v6 = vpack.c.bf16 %v2100_v53, %v2099_v49  ;;  %v2101_v23 = vld [vmem:[#allocation2 + $0x120] sm:$0xff]  ;;  %v2102_v43 = vld [vmem:[#allocation2 + $0x128] sm:$0xff] }
 0x375   : > { %v2103_v58 = vld [vmem:[#allocation2 + $0x130] sm:$0xff]  ;;  %2336 = vst [vmem:[%s3717_s5 + $0x78] sm:$0xff] %v2717_v47  ;;  %v2720_v9 = vpack.c.bf16 %v2102_v43, %v2101_v23  ;;  %v2104_v4 = vld [vmem:[#allocation2 + $0x138] sm:$0xff]  ;;  %v2105_v12 = vld [vmem:[#allocation2 + $0x140] sm:$0xff] }
 0x376   : > { %v2106_v57 = vld [vmem:[#allocation2 + $0x148] sm:$0xff]  ;;  %2337 = vst [vmem:[%s3717_s5 + $0x80] sm:$0xff] %v2718_v18  ;;  %2338 = vst [vmem:[%s3717_s5 + $0x88] sm:$0xff] %v2719_v6  ;;  %v2721_v27 = vpack.c.bf16 %v2104_v4, %v2103_v58  ;;  %v2107_v17 = vld [vmem:[#allocation2 + $0x150] sm:$0xff] }
 0x377   : > { %v2722_v39 = vpack.c.bf16 %v2106_v57, %v2105_v12  ;;  %v2108_v62 = vld [vmem:[#allocation2 + $0x158] sm:$0xff]  ;;  %v2109_v63 = vld [vmem:[#allocation2 + $0x160] sm:$0xff]  ;;  %2339 = vst [vmem:[%s3717_s5 + $0x90] sm:$0xff] %v2720_v9  ;;  %v2110_v2 = vld [vmem:[#allocation2 + $0x168] sm:$0xff] }
 0x378   : > { %v2723_v31 = vpack.c.bf16 %v2108_v62, %v2107_v17  ;;  %v2111_v5 = vld [vmem:[#allocation2 + $0x170] sm:$0xff]  ;;  %v2112_v0 = vld [vmem:[#allocation2 + $0x178] sm:$0xff]  ;;  %2340 = vst [vmem:[%s3717_s5 + $0x98] sm:$0xff] %v2721_v27  ;;  %v2724_v8 = vpack.c.bf16 %v2110_v2, %v2109_v63  ;;  %v2113_v14 = vld [vmem:[#allocation2 + $0x180] sm:$0xff] }
 0x379   : > { %2341 = vst [vmem:[%s3717_s5 + $0xa0] sm:$0xff] %v2722_v39  ;;  %v2725_v35 = vpack.c.bf16 %v2112_v0, %v2111_v5  ;;  %v2114_v34 = vld [vmem:[#allocation2 + $0x188] sm:$0xff]  ;;  %v2115_v38 = vld [vmem:[#allocation2 + $0x190] sm:$0xff]  ;;  %v2116_v15 = vld [vmem:[#allocation2 + $0x198] sm:$0xff] }
 0x37a   : > { %2342 = vst [vmem:[%s3717_s5 + $0xa8] sm:$0xff] %v2723_v31  ;;  %v2726_v3 = vpack.c.bf16 %v2114_v34, %v2113_v14  ;;  %v2117_v40 = vld [vmem:[#allocation2 + $0x1a0] sm:$0xff]  ;;  %v2118_v11 = vld [vmem:[#allocation2 + $0x1a8] sm:$0xff]  ;;  %2343 = vst [vmem:[%s3717_s5 + $0xb0] sm:$0xff] %v2724_v8  ;;  %v2727_v16 = vpack.c.bf16 %v2116_v15, %v2115_v38 }
 0x37b   : > { %2344 = vst [vmem:[%s3717_s5 + $0xb8] sm:$0xff] %v2725_v35  ;;  %v2728_v44 = vpack.c.bf16 %v2118_v11, %v2117_v40  ;;  %v2119_v7 = vld [vmem:[#allocation2 + $0x1b0] sm:$0xff]  ;;  %v2120_v22 = vld [vmem:[#allocation2 + $0x1b8] sm:$0xff]  ;;  %v2121_v20 = vld [vmem:[#allocation2 + $0x1c0] sm:$0xff] }
 0x37c   : > { %2345 = vst [vmem:[%s3717_s5 + $0xc0] sm:$0xff] %v2726_v3  ;;  %v2729_v48 = vpack.c.bf16 %v2120_v22, %v2119_v7  ;;  %v2122_v24 = vld [vmem:[#allocation2 + $0x1c8] sm:$0xff]  ;;  %v2123_v59 = vld [vmem:[#allocation2 + $0x1d0] sm:$0xff]  ;;  %v2124_v25 = vld [vmem:[#allocation2 + $0x1d8] sm:$0xff] }
 0x37d   : > { %2346 = vst [vmem:[%s3717_s5 + $0xc8] sm:$0xff] %v2727_v16  ;;  %2347 = vst [vmem:[%s3717_s5 + $0xd0] sm:$0xff] %v2728_v44  ;;  %v2730_v26 = vpack.c.bf16 %v2122_v24, %v2121_v20  ;;  %v2731_v52 = vpack.c.bf16 %v2124_v25, %v2123_v59  ;;  %v2125_v28 = vld [vmem:[#allocation2 + $0x1e0] sm:$0xff]  ;;  %v2126_v29 = vld [vmem:[#allocation2 + $0x1e8] sm:$0xff] }
 0x37e   : > { %v2127_v32 = vld [vmem:[#allocation2 + $0x1f0] sm:$0xff]  ;;  %2348 = vst [vmem:[%s3717_s5 + $0xd8] sm:$0xff] %v2729_v48  ;;  %v2732_v30 = vpack.c.bf16 %v2126_v29, %v2125_v28  ;;  %v2128_v55 = vld [vmem:[#allocation2 + $0x1f8] sm:$0xff] }
 0x37f   : > { %2349 = vst [vmem:[%s3717_s5 + $0xe0] sm:$0xff] %v2730_v26  ;;  %2350 = vst [vmem:[%s3717_s5 + $0xe8] sm:$0xff] %v2731_v52  ;;  %v2733_v56 = vpack.c.bf16 %v2128_v55, %v2127_v32 }
 0x380   : > { %2351 = vst [vmem:[%s3717_s5 + $0xf0] sm:$0xff] %v2732_v30 }
 0x381   : > { %2352 = vst [vmem:[%s3717_s5 + $0xf8] sm:$0xff] %v2733_v56 }
 0x382 PF: > { %s4290_s20 = sld [smem:[#allocation23_spill]]  ;;  %s2735_s9 = sshll.u32 %s3346_s21, 12 }
 0x383   : > { %s4291_s26 = sld [smem:[#allocation32_spill]]  ;;  %s2368_s11 = sshll.u32 %s3717_s5, 4  ;;  %s4151_s11 = int_to_ptr.vmem [resolvable:$true] %s2368_s11 }
 0x384   : > { %s2354_s2 = scalar_lea.sflag [#allocation9], %s3677_s27  ;;  %s3218_s29 = scalar_lea.vmem %s4151_s11, 4096 }
 0x385   : > { %p3219_p5 = scmp.ne.s32.totalorder %s4151_s11, %s3218_s29  ;;  %s3373_s23 = smov [#allocation12]  }
 0x386   : > { %s3222_s7 = sshll.u32 %s3373_s23, 4  ;;  %s3223_s7 = int_to_ptr.vmem [resolvable:$false] %s3222_s7 }
 0x387   : > { %s3224_s21 = scalar_lea.vmem %s3223_s7, 8192  ;;  %p3225_p11 = scmp.lt.s32.totalorder %s4151_s11, %s3223_s7 }
 0x388   : > { %p4292_p4 = scmp.ne.s32.totalorder %s4290_s20, 0  ;;  %p3226_p0 = scmp.lt.s32.totalorder %s3224_s21, %s3218_s29 }
 0x389   : > { %s4148_s12 = scalar_lea.hbm %s4291_s26, %s2735_s9 }
 0x38a   : > { %p3220_p13 = pnand %p3219_p5, %p4292_p4  ;;  %p3227_p8 = por %p3226_p0, %p3225_p11 }
 0x38c   : > { %p3221_p9 = pneg %p3220_p13 }
 0x38e   : > { %p3228_p6 = pnand %p3227_p8, %p3221_p9 }
 0x390   : > { %3231 = shalt.err (!%p3228_p6)
}
 0x391   : > { %s3232_s5 = scalar_lea.hbm %s4148_s12, 4096  ;;  %s3236_s16 = scalar_lea.hbm %s4291_s26, 8192 }
 0x392   : > { %p3233_p2 = scmp.ne.s32.totalorder %s4148_s12, %s3232_s5  ;;  %p3237_p12 = scmp.lt.u32.totalorder %s4148_s12, %s4291_s26 }
 0x393   : > { %p3238_p3 = scmp.lt.u32.totalorder %s3236_s16, %s3232_s5  ;;  %p3240_p5 = scmp.lt.u32.totalorder %s3232_s5, %s4148_s12 }
 0x394   : > { %p3234_p7 = pnand %p3233_p2, %p4292_p4 }
 0x395   : > { %p3239_p1 = por %p3238_p3, %p3237_p12 }
 0x396   : > { %p3235_p10 = pneg %p3234_p7 }
 0x397   : > { %p3241_p13 = por %p3240_p5, %p3239_p1 }
 0x399   : > { %p3242_p9 = pnand %p3241_p13, %p3235_p10 }
 0x39b   : > { %3245 = shalt.err (!%p3242_p9)
}
 0x39c   : > { %s3374_s10 = smov 128   ;;  %s3375_s19 = smov 8  }
 0x39d   : > { %2742 = dma.vmem_to_hbm [thread:$0]  (%p4292_p4), %s4151_s11, 4096, %s4148_s12, %s2354_s2, %s3374_s10, %s3374_s10, %s3375_s19  }
 0x39e PF: > { %s4293_s3 = sld [smem:[#allocation19_spill]]  ;;  %s4294_s4 = sld [smem:[#allocation24_spill]] }
 0x39f   : > { %p2758_p11 = scmp.ge.s32.totalorder %s3362_s25, 2 }
 0x3a4   : > { %s2383_s9 = sand.u32 1, %s4293_s3   ;;  %p4295_p0 = scmp.ne.s32.totalorder %s4294_s4, 0 }
 0x3a5   : > { %s2384_s8 = scalar_lea.sflag [#allocation9], %s2383_s9 }
 0x3a6   : > { %p2754_p8 = pnand %p2758_p11, %p4295_p0 }
 0x3a8   : > { %3309 = dma.done.wait (!%p2754_p8), %s2384_s8, 4096  }
 0x3a9   : > { %3311 = vsyncadd (!%p2754_p8), %s2384_s8, 4294963200  ;;  %s40_s25 = sadd.s32 1, %s3362_s25   ;;  %s4297_s19 = sld [smem:[#allocation21_spill]] }
 0x3aa   : > { %p4182_p6 = scmp.ge.s32.totalorder %s40_s25, 130   ;;  %s4298_s20 = sld [smem:[#allocation22_spill]] }
 0x3ab   : > { %s4299_s27 = sld [smem:[#allocation25_spill]]  ;;  %s4300_s23 = sld [smem:[#allocation26_spill]] }
 0x3ac   : > { %s4301_s12 = sld [smem:[#allocation27_spill]]  ;;  %s4302_s2 = smov %s3318_s14 }
 0x3ad   : > { %s4303_s14 = smov %s3322_s15  ;;  %s4304_s15 = smov %s3634_s13 }
 0x3ae   : > { %s4305_s16 = smov %s3330_s17  ;;  %s4306_s17 = smov %s3334_s18 }
 0x3af   : > { %s4307_s18 = smov %s3614_s22  ;;  %s4308_s21 = smov %s3358_s24 }
 0x3b0   :  { %39 = sbr.rel (!%p4182_p6) target bundleno = 50 (0x32), region = 112 }
 0x3b1   : > { %s4309_s22 = smov %s4299_s27 }
 0x3b2   : > { %s4310_s24 = smov %s4301_s12 }
 0x3b7   :  { %2389 = vsyncpa [#allocation8], 1 }
 0x3b8   :  { %2391 = vsyncpa [#allocation8 + $0x1], 1 }
 0x3b9   :  { %2392 = vsyncpa [#allocation11], 1 }
 0x3ba   :  { %2394 = vsyncpa [#allocation11 + $0x1], 1 }
 0x3bb   :  { %2395 = vsyncpa [#allocation9], 1 }
 0x3bc   :  { %2397 = vsyncpa [#allocation9 + $0x1], 1 }

</bundles_post_ra>
